<compile_context>
chip_gen: v7x
topology: tpu7x:2x2x1
jax: 0.10.0
libtpu: 0.0.40
codegen_flags: <defaults>
</compile_context>

<pallas_src>
import jax
import jax.numpy as jnp
from jax.experimental import pallas as pl
from jax.experimental.pallas import tpu as pltpu  # noqa: F401  (kept for easy extension)

# ---- model hyperparameters (small, TPU-tile friendly: B*S multiple of 8, H multiple of 128)
B, S, H = 2, 8, 128
BS = B * S
NUM_HEADS = 2
HEAD_DIM = H // NUM_HEADS
FFN = 256
VOCAB = 100
NUM_LAYERS = 2
LN_EPS = 1e-12
ATTN_SCALE = 1.0 / (HEAD_DIM ** 0.5)


# ----------------------------------------------------------------------------
# Kernel
# ----------------------------------------------------------------------------
def _layernorm(x, gamma, beta):
    mu = jnp.mean(x, axis=-1, keepdims=True)
    var = jnp.mean((x - mu) ** 2, axis=-1, keepdims=True)
    return (x - mu) * jax.lax.rsqrt(var + LN_EPS) * gamma + beta


def fused_encoder_kernel(x_ref, bias_ref, embg_ref, embb_ref,
                         wqkv_ref, bqkv_ref, wo_ref, bo_ref,
                         ln1g_ref, ln1b_ref, w1_ref, b1_ref, w2_ref, b2_ref,
                         ln2g_ref, ln2b_ref, o_ref):
    """Whole encoder forward in a single grid-less invocation; activations stay in vregs."""
    x = _layernorm(x_ref[...], embg_ref[...], embb_ref[...])      # [BS, H] f32
    bias = bias_ref[...]                                          # [BS, BS] block-diag mask bias

    for layer in range(NUM_LAYERS):            # static unroll; all weights resident in VMEM
        xb = x.astype(jnp.bfloat16)

        # fused QKV projection (1/sqrt(HEAD_DIM) scale pre-folded into the Q block)
        qkv = jnp.dot(xb, wqkv_ref[layer],
                      preferred_element_type=jnp.float32) + bqkv_ref[layer]   # [BS, 3H]

        ctx_heads = []
        for h in range(NUM_HEADS):             # static head loop, static lane slices
            qh = qkv[:, h * HEAD_DIM:(h + 1) * HEAD_DIM].astype(jnp.bfloat16)
            kh = qkv[:, H + h * HEAD_DIM:H + (h + 1) * HEAD_DIM].astype(jnp.bfloat16)
            vh = qkv[:, 2 * H + h * HEAD_DIM:2 * H + (h + 1) * HEAD_DIM].astype(jnp.bfloat16)

            # [BS, BS] scores via one 2-D MXU dot (contract last dims == q @ k^T)
            s = jax.lax.dot_general(qh, kh, (((1,), (1,)), ((), ())),
                                    preferred_element_type=jnp.float32) + bias
            s = s - jnp.max(s, axis=-1, keepdims=True)
            p = jnp.exp(s)
            p = p * pl.reciprocal(jnp.sum(p, axis=-1, keepdims=True), approx=True)

            ctx_heads.append(jnp.dot(p.astype(jnp.bfloat16), vh,
                                     preferred_element_type=jnp.float32))     # [BS, HEAD_DIM]
        ctx = jnp.concatenate(ctx_heads, axis=-1)                             # [BS, H], in vregs

        attn = jnp.dot(ctx.astype(jnp.bfloat16), wo_ref[layer],
                       preferred_element_type=jnp.float32) + bo_ref[layer]
        x = _layernorm(x + attn, ln1g_ref[layer], ln1b_ref[layer])

        # --- feed-forward
        h1 = jnp.dot(x.astype(jnp.bfloat16), w1_ref[layer],
                     preferred_element_type=jnp.float32) + b1_ref[layer]
        # TODO(synk): real HF BERT default is exact erf GELU; tanh approximation kept here
        # (the in-file reference uses the same approximation).
        h1 = jax.nn.gelu(h1)
        h2 = jnp.dot(h1.astype(jnp.bfloat16), w2_ref[layer],
                     preferred_element_type=jnp.float32) + b2_ref[layer]
        x = _layernorm(x + h2, ln2g_ref[layer], ln2b_ref[layer])

    # CLS pooling, executed exactly once: row b*S of the flattened activations.
    # The intermediate [BS, H] never hits HBM; only the lane-dense [B, H] output does.
    for b in range(B):
        o_ref[b:b + 1, :] = x[b * S:b * S + 1, :]


# ----------------------------------------------------------------------------
# Weight packing (done once, outside the forward)
# ----------------------------------------------------------------------------
def pack_layer_params(params):
    """Pack stacked per-layer weights for the kernel: fused QKV with scale folded into Q."""
    stk = params['layers']
    scale = jnp.float32(ATTN_SCALE)           # 1/8: exact power of two, lossless in bf16
    wqkv = jnp.concatenate(
        [(stk['wq'].astype(jnp.float32) * scale).astype(jnp.bfloat16),
         stk['wk'], stk['wv']], axis=-1)                                     # [L, H, 3H] bf16
    bqkv = jnp.concatenate([stk['bq'] * scale, stk['bk'], stk['bv']], axis=-1)  # [L, 1, 3H] f32
    return {
        'tok_emb': params['tok_emb'], 'pos_emb': params['pos_emb'],
        'emb_ln_g': params['emb_ln_g'], 'emb_ln_b': params['emb_ln_b'],
        'wqkv': wqkv, 'bqkv': bqkv,
        'wo': stk['wo'], 'bo': stk['bo'],
        'ln1_g': stk['ln1_g'], 'ln1_b': stk['ln1_b'],
        'w1': stk['w1'], 'b1': stk['b1'],
        'w2': stk['w2'], 'b2': stk['b2'],
        'ln2_g': stk['ln2_g'], 'ln2_b': stk['ln2_b'],
    }


# ----------------------------------------------------------------------------
# pallas_call wrapper  (the whole forward = ONE grid-less kernel launch)
# ----------------------------------------------------------------------------
def retriever_forward(packed, input_ids, attention_mask):
    # embedding gather + positional embeddings (data-dependent gather: plain JAX glue),
    # flattened to [B*S, H]
    x = (packed['tok_emb'][input_ids] + packed['pos_emb'][None, :, :]).reshape(BS, H)

    # Block-diagonal additive attention bias on the flattened [BS, BS] score matrix:
    # 0 for (same batch, valid key), -1e9 for padded keys AND cross-batch pairs
    # (cross-batch masking is required for correctness of the flattened attention).
    batch_ids = jnp.arange(BS, dtype=jnp.int32) // S
    same_batch = batch_ids[:, None] == batch_ids[None, :]
    key_valid = attention_mask.reshape(BS).astype(jnp.bool_)[None, :]
    bias = jnp.where(same_batch & key_valid, 0.0, -1e9).astype(jnp.float32)   # [BS, BS]

    # No grid: every array fits comfortably in VMEM (~0.5 MiB of weights), so the whole
    # arrays are passed as single VMEM blocks and there is zero per-step pipeline overhead.
    return pl.pallas_call(
        fused_encoder_kernel,
        out_shape=jax.ShapeDtypeStruct((B, H), jnp.float32),
    )(x, bias, packed['emb_ln_g'], packed['emb_ln_b'],
      packed['wqkv'], packed['bqkv'], packed['wo'], packed['bo'],
      packed['ln1_g'], packed['ln1_b'], packed['w1'], packed['b1'],
      packed['w2'], packed['b2'], packed['ln2_g'], packed['ln2_b'])


# ----------------------------------------------------------------------------
# Parameters (deterministic, synthetic backbone); matmul weights stored in bf16
# ----------------------------------------------------------------------------
def init_params(key):
    keys = iter(jax.random.split(key, 64))

    def nrm(shape, dtype=jnp.float32):
        return (0.02 * jax.random.normal(next(keys), shape, jnp.float32)).astype(dtype)

    L = NUM_LAYERS
    p = {
        'tok_emb': nrm((VOCAB, H)),
        'pos_emb': nrm((S, H)),
        'emb_ln_g': jnp.ones((1, H), jnp.float32),
        'emb_ln_b': jnp.zeros((1, H), jnp.float32),
        'layers': {
            'wq': nrm((L, H, H), jnp.bfloat16), 'bq': nrm((L, 1, H)),
            'wk': nrm((L, H, H), jnp.bfloat16), 'bk': nrm((L, 1, H)),
            'wv': nrm((L, H, H), jnp.bfloat16), 'bv': nrm((L, 1, H)),
            'wo': nrm((L, H, H), jnp.bfloat16), 'bo': nrm((L, 1, H)),
            'ln1_g': jnp.ones((L, 1, H), jnp.float32),
            'ln1_b': jnp.zeros((L, 1, H), jnp.float32),
            'w1': nrm((L, H, FFN), jnp.bfloat16), 'b1': nrm((L, 1, FFN)),
            'w2': nrm((L, FFN, H), jnp.bfloat16), 'b2': nrm((L, 1, H)),
            'ln2_g': jnp.ones((L, 1, H), jnp.float32),
            'ln2_b': jnp.zeros((L, 1, H), jnp.float32),
        },
    }
    return p


# ----------------------------------------------------------------------------
# pure-JAX (f32) reference for a correctness check of the Pallas path
# ----------------------------------------------------------------------------
def _reference_forward(params, input_ids, attention_mask):
    stk = params['layers']
    x = params['tok_emb'][input_ids] + params['pos_emb'][None, :, :]
    x = _layernorm(x, params['emb_ln_g'], params['emb_ln_b'])
    bias = (1.0 - attention_mask.astype(jnp.float32))[:, None, None, :] * (-1e9)
    for l in range(NUM_LAYERS):
        g = lambda n: stk[n][l].astype(jnp.float32)
        q = x @ g('wq') + g('bq')
        k = x @ g('wk') + g('bk')
        v = x @ g('wv') + g('bv')

        def split(t):
            return t.reshape(B, S, NUM_HEADS, HEAD_DIM).transpose(0, 2, 1, 3)

        qh, kh, vh = split(q), split(k), split(v)
        sc = jnp.einsum('bhqd,bhkd->bhqk', qh, kh) / (HEAD_DIM ** 0.5) + bias
        pr = jax.nn.softmax(sc, axis=-1)
        ctx = jnp.einsum('bhqk,bhkd->bhqd', pr, vh).transpose(0, 2, 1, 3).reshape(B, S, H)
        x = _layernorm(x + ctx @ g('wo') + g('bo'), g('ln1_g'), g('ln1_b'))
        h1 = jax.nn.gelu(x @ g('w1') + g('b1'))
        x = _layernorm(x + h1 @ g('w2') + g('b2'), g('ln2_g'), g('ln2_b'))
    return x[:, 0, :]


if __name__ == "__main__":
    key = jax.random.PRNGKey(0)
    k_par, k_ids = jax.random.split(key)
    params = init_params(k_par)
    packed = pack_layer_params(params)

    input_ids = jax.random.randint(k_ids, (B, S), 0, VOCAB, dtype=jnp.int32)
    # batch 0: all real tokens; batch 1: last 3 positions are padding
    attention_mask = jnp.array([[1] * S, [1] * (S - 3) + [0] * 3], dtype=jnp.int32)

    emb = jax.jit(retriever_forward)(packed, input_ids, attention_mask)
    emb = jax.block_until_ready(emb)

    ref = _reference_forward(params, input_ids, attention_mask)
    assert emb.shape == (B, H), emb.shape
    max_err = float(jnp.max(jnp.abs(emb - ref)))
    assert jnp.allclose(emb, ref, atol=5e-2, rtol=5e-2), f"mismatch vs reference (max err {max_err})"

    print("KERNEL_OK")
</pallas_src>

<mosaic_0001>
module attributes {stable_mosaic.version = 11 : i64} {
  func.func @fused_encoder_kernel(%arg0: memref<16x128xf32, #tpu.memory_space<vmem>>, %arg1: memref<16x16xf32, #tpu.memory_space<vmem>>, %arg2: memref<1x128xf32, #tpu.memory_space<vmem>>, %arg3: memref<1x128xf32, #tpu.memory_space<vmem>>, %arg4: memref<2x128x384xbf16, #tpu.memory_space<vmem>>, %arg5: memref<2x1x384xf32, #tpu.memory_space<vmem>>, %arg6: memref<2x128x128xbf16, #tpu.memory_space<vmem>>, %arg7: memref<2x1x128xf32, #tpu.memory_space<vmem>>, %arg8: memref<2x1x128xf32, #tpu.memory_space<vmem>>, %arg9: memref<2x1x128xf32, #tpu.memory_space<vmem>>, %arg10: memref<2x128x256xbf16, #tpu.memory_space<vmem>>, %arg11: memref<2x1x256xf32, #tpu.memory_space<vmem>>, %arg12: memref<2x256x128xbf16, #tpu.memory_space<vmem>>, %arg13: memref<2x1x128xf32, #tpu.memory_space<vmem>>, %arg14: memref<2x1x128xf32, #tpu.memory_space<vmem>>, %arg15: memref<2x1x128xf32, #tpu.memory_space<vmem>>, %arg16: memref<2x128xf32, #tpu.memory_space<vmem>>) attributes {dimension_semantics = [], scalar_prefetch = 0 : i64, scratch_operands = 0 : i64, tpu.core_type = #tpu.core_type<tc>} {
    %c0 = arith.constant 0 : index
    %c0_0 = arith.constant 0 : index
    %0 = vector.load %arg0[%c0, %c0_0] : memref<16x128xf32, #tpu.memory_space<vmem>>, vector<16x128xf32>
    %c0_1 = arith.constant 0 : index
    %c0_2 = arith.constant 0 : index
    %1 = vector.load %arg2[%c0_1, %c0_2] : memref<1x128xf32, #tpu.memory_space<vmem>>, vector<1x128xf32>
    %c0_3 = arith.constant 0 : index
    %c0_4 = arith.constant 0 : index
    %2 = vector.load %arg3[%c0_3, %c0_4] : memref<1x128xf32, #tpu.memory_space<vmem>>, vector<1x128xf32>
    %cst = arith.constant dense<0.000000e+00> : vector<16xf32>
    %3 = vector.multi_reduction <add>, %0, %cst [1] : vector<16x128xf32> to vector<16xf32>
    %4 = vector.shape_cast %3 : vector<16xf32> to vector<16x1xf32>
    %cst_5 = arith.constant 1.280000e+02 : f32
    %5 = vector.broadcast %cst_5 : f32 to vector<16x1xf32>
    %6 = arith.divf %4, %5 : vector<16x1xf32>
    %7 = vector.broadcast %6 : vector<16x1xf32> to vector<16x128xf32>
    %8 = arith.subf %0, %7 : vector<16x128xf32>
    %9 = arith.mulf %8, %8 : vector<16x128xf32>
    %cst_6 = arith.constant dense<0.000000e+00> : vector<16xf32>
    %10 = vector.multi_reduction <add>, %9, %cst_6 [1] : vector<16x128xf32> to vector<16xf32>
    %11 = vector.shape_cast %10 : vector<16xf32> to vector<16x1xf32>
    %cst_7 = arith.constant 1.280000e+02 : f32
    %12 = vector.broadcast %cst_7 : f32 to vector<16x1xf32>
    %13 = arith.divf %11, %12 : vector<16x1xf32>
    %14 = vector.broadcast %6 : vector<16x1xf32> to vector<16x128xf32>
    %15 = arith.subf %0, %14 : vector<16x128xf32>
    %cst_8 = arith.constant 9.99999996E-13 : f32
    %16 = vector.broadcast %cst_8 : f32 to vector<16x1xf32>
    %17 = arith.addf %13, %16 : vector<16x1xf32>
    %18 = math.rsqrt %17 : vector<16x1xf32>
    %19 = vector.broadcast %18 : vector<16x1xf32> to vector<16x128xf32>
    %20 = arith.mulf %15, %19 : vector<16x128xf32>
    %21 = vector.broadcast %1 : vector<1x128xf32> to vector<16x128xf32>
    %22 = arith.mulf %20, %21 : vector<16x128xf32>
    %23 = vector.broadcast %2 : vector<1x128xf32> to vector<16x128xf32>
    %24 = arith.addf %22, %23 : vector<16x128xf32>
    %c0_9 = arith.constant 0 : index
    %c0_10 = arith.constant 0 : index
    %25 = vector.load %arg1[%c0_9, %c0_10] : memref<16x16xf32, #tpu.memory_space<vmem>>, vector<16x16xf32>
    %26 = arith.truncf %24 : vector<16x128xf32> to vector<16x128xbf16>
    %c0_11 = arith.constant 0 : index
    %c0_12 = arith.constant 0 : index
    %c0_13 = arith.constant 0 : index
    %27 = vector.load %arg4[%c0_11, %c0_12, %c0_13] : memref<2x128x384xbf16, #tpu.memory_space<vmem>>, vector<1x128x384xbf16>
    %28 = vector.shape_cast %27 : vector<1x128x384xbf16> to vector<128x384xbf16>
    %cst_14 = arith.constant dense<0.000000e+00> : vector<16x384xf32>
    %29 = tpu.matmul %26, %28, %cst_14 {dimension_numbers = #tpu.dot_dimension_numbers<[1], [0], [0], [1], [0, 0, 1, 1], [], []>} : vector<16x128xbf16>, vector<128x384xbf16>, vector<16x384xf32> -> vector<16x384xf32>
    %c0_15 = arith.constant 0 : index
    %c0_16 = arith.constant 0 : index
    %c0_17 = arith.constant 0 : index
    %30 = vector.load %arg5[%c0_15, %c0_16, %c0_17] : memref<2x1x384xf32, #tpu.memory_space<vmem>>, vector<1x1x384xf32>
    %31 = vector.shape_cast %30 : vector<1x1x384xf32> to vector<1x384xf32>
    %32 = vector.broadcast %31 : vector<1x384xf32> to vector<16x384xf32>
    %33 = arith.addf %29, %32 : vector<16x384xf32>
    %34 = vector.extract_strided_slice %33 {offsets = [0, 0], sizes = [16, 64], strides = [1, 1]} : vector<16x384xf32> to vector<16x64xf32>
    %35 = arith.truncf %34 : vector<16x64xf32> to vector<16x64xbf16>
    %36 = vector.extract_strided_slice %33 {offsets = [0, 128], sizes = [16, 64], strides = [1, 1]} : vector<16x384xf32> to vector<16x64xf32>
    %37 = arith.truncf %36 : vector<16x64xf32> to vector<16x64xbf16>
    %38 = vector.extract_strided_slice %33 {offsets = [0, 256], sizes = [16, 64], strides = [1, 1]} : vector<16x384xf32> to vector<16x64xf32>
    %39 = arith.truncf %38 : vector<16x64xf32> to vector<16x64xbf16>
    %cst_18 = arith.constant dense<0.000000e+00> : vector<16x16xf32>
    %40 = tpu.matmul %35, %37, %cst_18 {dimension_numbers = #tpu.dot_dimension_numbers<[1], [1], [0], [0], [0, 0, 1, 0], [], []>} : vector<16x64xbf16>, vector<16x64xbf16>, vector<16x16xf32> -> vector<16x16xf32>
    %41 = arith.addf %40, %25 : vector<16x16xf32>
    %cst_19 = arith.constant dense<0xFF800000> : vector<16xf32>
    %42 = vector.multi_reduction <maximumf>, %41, %cst_19 [1] : vector<16x16xf32> to vector<16xf32>
    %43 = vector.shape_cast %42 : vector<16xf32> to vector<16x1xf32>
    %44 = vector.broadcast %43 : vector<16x1xf32> to vector<16x16xf32>
    %45 = arith.subf %41, %44 : vector<16x16xf32>
    %46 = math.exp %45 : vector<16x16xf32>
    %cst_20 = arith.constant dense<0.000000e+00> : vector<16xf32>
    %47 = vector.multi_reduction <add>, %46, %cst_20 [1] : vector<16x16xf32> to vector<16xf32>
    %48 = vector.shape_cast %47 : vector<16xf32> to vector<16x1xf32>
    %49 = tpu.reciprocal %48 {approx = true} : vector<16x1xf32> -> vector<16x1xf32>
    %50 = vector.broadcast %49 : vector<16x1xf32> to vector<16x16xf32>
    %51 = arith.mulf %46, %50 : vector<16x16xf32>
    %52 = arith.truncf %51 : vector<16x16xf32> to vector<16x16xbf16>
    %cst_21 = arith.constant dense<0.000000e+00> : vector<16x64xf32>
    %53 = tpu.matmul %52, %39, %cst_21 {dimension_numbers = #tpu.dot_dimension_numbers<[1], [0], [0], [1], [0, 0, 1, 1], [], []>} : vector<16x16xbf16>, vector<16x64xbf16>, vector<16x64xf32> -> vector<16x64xf32>
    %54 = vector.extract_strided_slice %33 {offsets = [0, 64], sizes = [16, 64], strides = [1, 1]} : vector<16x384xf32> to vector<16x64xf32>
    %55 = arith.truncf %54 : vector<16x64xf32> to vector<16x64xbf16>
    %56 = vector.extract_strided_slice %33 {offsets = [0, 192], sizes = [16, 64], strides = [1, 1]} : vector<16x384xf32> to vector<16x64xf32>
    %57 = arith.truncf %56 : vector<16x64xf32> to vector<16x64xbf16>
    %58 = vector.extract_strided_slice %33 {offsets = [0, 320], sizes = [16, 64], strides = [1, 1]} : vector<16x384xf32> to vector<16x64xf32>
    %59 = arith.truncf %58 : vector<16x64xf32> to vector<16x64xbf16>
    %cst_22 = arith.constant dense<0.000000e+00> : vector<16x16xf32>
    %60 = tpu.matmul %55, %57, %cst_22 {dimension_numbers = #tpu.dot_dimension_numbers<[1], [1], [0], [0], [0, 0, 1, 0], [], []>} : vector<16x64xbf16>, vector<16x64xbf16>, vector<16x16xf32> -> vector<16x16xf32>
    %61 = arith.addf %60, %25 : vector<16x16xf32>
    %cst_23 = arith.constant dense<0xFF800000> : vector<16xf32>
    %62 = vector.multi_reduction <maximumf>, %61, %cst_23 [1] : vector<16x16xf32> to vector<16xf32>
    %63 = vector.shape_cast %62 : vector<16xf32> to vector<16x1xf32>
    %64 = vector.broadcast %63 : vector<16x1xf32> to vector<16x16xf32>
    %65 = arith.subf %61, %64 : vector<16x16xf32>
    %66 = math.exp %65 : vector<16x16xf32>
    %cst_24 = arith.constant dense<0.000000e+00> : vector<16xf32>
    %67 = vector.multi_reduction <add>, %66, %cst_24 [1] : vector<16x16xf32> to vector<16xf32>
    %68 = vector.shape_cast %67 : vector<16xf32> to vector<16x1xf32>
    %69 = tpu.reciprocal %68 {approx = true} : vector<16x1xf32> -> vector<16x1xf32>
    %70 = vector.broadcast %69 : vector<16x1xf32> to vector<16x16xf32>
    %71 = arith.mulf %66, %70 : vector<16x16xf32>
    %72 = arith.truncf %71 : vector<16x16xf32> to vector<16x16xbf16>
    %cst_25 = arith.constant dense<0.000000e+00> : vector<16x64xf32>
    %73 = tpu.matmul %72, %59, %cst_25 {dimension_numbers = #tpu.dot_dimension_numbers<[1], [0], [0], [1], [0, 0, 1, 1], [], []>} : vector<16x16xbf16>, vector<16x64xbf16>, vector<16x64xf32> -> vector<16x64xf32>
    %74 = tpu.concatenate %53, %73 in 1 : vector<16x64xf32>, vector<16x64xf32> -> vector<16x128xf32>
    %75 = arith.truncf %74 : vector<16x128xf32> to vector<16x128xbf16>
    %c0_26 = arith.constant 0 : index
    %c0_27 = arith.constant 0 : index
    %c0_28 = arith.constant 0 : index
    %76 = vector.load %arg6[%c0_26, %c0_27, %c0_28] : memref<2x128x128xbf16, #tpu.memory_space<vmem>>, vector<1x128x128xbf16>
    %77 = vector.shape_cast %76 : vector<1x128x128xbf16> to vector<128x128xbf16>
    %cst_29 = arith.constant dense<0.000000e+00> : vector<16x128xf32>
    %78 = tpu.matmul %75, %77, %cst_29 {dimension_numbers = #tpu.dot_dimension_numbers<[1], [0], [0], [1], [0, 0, 1, 1], [], []>} : vector<16x128xbf16>, vector<128x128xbf16>, vector<16x128xf32> -> vector<16x128xf32>
    %c0_30 = arith.constant 0 : index
    %c0_31 = arith.constant 0 : index
    %c0_32 = arith.constant 0 : index
    %79 = vector.load %arg7[%c0_30, %c0_31, %c0_32] : memref<2x1x128xf32, #tpu.memory_space<vmem>>, vector<1x1x128xf32>
    %80 = vector.shape_cast %79 : vector<1x1x128xf32> to vector<1x128xf32>
    %81 = vector.broadcast %80 : vector<1x128xf32> to vector<16x128xf32>
    %82 = arith.addf %78, %81 : vector<16x128xf32>
    %83 = arith.addf %24, %82 : vector<16x128xf32>
    %c0_33 = arith.constant 0 : index
    %c0_34 = arith.constant 0 : index
    %c0_35 = arith.constant 0 : index
    %84 = vector.load %arg8[%c0_33, %c0_34, %c0_35] : memref<2x1x128xf32, #tpu.memory_space<vmem>>, vector<1x1x128xf32>
    %85 = vector.shape_cast %84 : vector<1x1x128xf32> to vector<1x128xf32>
    %c0_36 = arith.constant 0 : index
    %c0_37 = arith.constant 0 : index
    %c0_38 = arith.constant 0 : index
    %86 = vector.load %arg9[%c0_36, %c0_37, %c0_38] : memref<2x1x128xf32, #tpu.memory_space<vmem>>, vector<1x1x128xf32>
    %87 = vector.shape_cast %86 : vector<1x1x128xf32> to vector<1x128xf32>
    %cst_39 = arith.constant dense<0.000000e+00> : vector<16xf32>
    %88 = vector.multi_reduction <add>, %83, %cst_39 [1] : vector<16x128xf32> to vector<16xf32>
    %89 = vector.shape_cast %88 : vector<16xf32> to vector<16x1xf32>
    %cst_40 = arith.constant 1.280000e+02 : f32
    %90 = vector.broadcast %cst_40 : f32 to vector<16x1xf32>
    %91 = arith.divf %89, %90 : vector<16x1xf32>
    %92 = vector.broadcast %91 : vector<16x1xf32> to vector<16x128xf32>
    %93 = arith.subf %83, %92 : vector<16x128xf32>
    %94 = arith.mulf %93, %93 : vector<16x128xf32>
    %cst_41 = arith.constant dense<0.000000e+00> : vector<16xf32>
    %95 = vector.multi_reduction <add>, %94, %cst_41 [1] : vector<16x128xf32> to vector<16xf32>
    %96 = vector.shape_cast %95 : vector<16xf32> to vector<16x1xf32>
    %cst_42 = arith.constant 1.280000e+02 : f32
    %97 = vector.broadcast %cst_42 : f32 to vector<16x1xf32>
    %98 = arith.divf %96, %97 : vector<16x1xf32>
    %99 = vector.broadcast %91 : vector<16x1xf32> to vector<16x128xf32>
    %100 = arith.subf %83, %99 : vector<16x128xf32>
    %cst_43 = arith.constant 9.99999996E-13 : f32
    %101 = vector.broadcast %cst_43 : f32 to vector<16x1xf32>
    %102 = arith.addf %98, %101 : vector<16x1xf32>
    %103 = math.rsqrt %102 : vector<16x1xf32>
    %104 = vector.broadcast %103 : vector<16x1xf32> to vector<16x128xf32>
    %105 = arith.mulf %100, %104 : vector<16x128xf32>
    %106 = vector.broadcast %85 : vector<1x128xf32> to vector<16x128xf32>
    %107 = arith.mulf %105, %106 : vector<16x128xf32>
    %108 = vector.broadcast %87 : vector<1x128xf32> to vector<16x128xf32>
    %109 = arith.addf %107, %108 : vector<16x128xf32>
    %110 = arith.truncf %109 : vector<16x128xf32> to vector<16x128xbf16>
    %c0_44 = arith.constant 0 : index
    %c0_45 = arith.constant 0 : index
    %c0_46 = arith.constant 0 : index
    %111 = vector.load %arg10[%c0_44, %c0_45, %c0_46] : memref<2x128x256xbf16, #tpu.memory_space<vmem>>, vector<1x128x256xbf16>
    %112 = vector.shape_cast %111 : vector<1x128x256xbf16> to vector<128x256xbf16>
    %cst_47 = arith.constant dense<0.000000e+00> : vector<16x256xf32>
    %113 = tpu.matmul %110, %112, %cst_47 {dimension_numbers = #tpu.dot_dimension_numbers<[1], [0], [0], [1], [0, 0, 1, 1], [], []>} : vector<16x128xbf16>, vector<128x256xbf16>, vector<16x256xf32> -> vector<16x256xf32>
    %c0_48 = arith.constant 0 : index
    %c0_49 = arith.constant 0 : index
    %c0_50 = arith.constant 0 : index
    %114 = vector.load %arg11[%c0_48, %c0_49, %c0_50] : memref<2x1x256xf32, #tpu.memory_space<vmem>>, vector<1x1x256xf32>
    %115 = vector.shape_cast %114 : vector<1x1x256xf32> to vector<1x256xf32>
    %116 = vector.broadcast %115 : vector<1x256xf32> to vector<16x256xf32>
    %117 = arith.addf %113, %116 : vector<16x256xf32>
    %118 = arith.mulf %117, %117 : vector<16x256xf32>
    %119 = arith.mulf %117, %118 : vector<16x256xf32>
    %cst_51 = arith.constant 4.471500e-02 : f32
    %120 = vector.broadcast %cst_51 : f32 to vector<16x256xf32>
    %121 = arith.mulf %120, %119 : vector<16x256xf32>
    %122 = arith.addf %117, %121 : vector<16x256xf32>
    %cst_52 = arith.constant 0.797884583 : f32
    %123 = vector.broadcast %cst_52 : f32 to vector<16x256xf32>
    %124 = arith.mulf %123, %122 : vector<16x256xf32>
    %125 = math.tanh %124 : vector<16x256xf32>
    %cst_53 = arith.constant 1.000000e+00 : f32
    %126 = vector.broadcast %cst_53 : f32 to vector<16x256xf32>
    %127 = arith.addf %126, %125 : vector<16x256xf32>
    %cst_54 = arith.constant 5.000000e-01 : f32
    %128 = vector.broadcast %cst_54 : f32 to vector<16x256xf32>
    %129 = arith.mulf %128, %127 : vector<16x256xf32>
    %130 = arith.mulf %117, %129 : vector<16x256xf32>
    %131 = arith.truncf %130 : vector<16x256xf32> to vector<16x256xbf16>
    %c0_55 = arith.constant 0 : index
    %c0_56 = arith.constant 0 : index
    %c0_57 = arith.constant 0 : index
    %132 = vector.load %arg12[%c0_55, %c0_56, %c0_57] : memref<2x256x128xbf16, #tpu.memory_space<vmem>>, vector<1x256x128xbf16>
    %133 = vector.shape_cast %132 : vector<1x256x128xbf16> to vector<256x128xbf16>
    %cst_58 = arith.constant dense<0.000000e+00> : vector<16x128xf32>
    %134 = tpu.matmul %131, %133, %cst_58 {dimension_numbers = #tpu.dot_dimension_numbers<[1], [0], [0], [1], [0, 0, 1, 1], [], []>} : vector<16x256xbf16>, vector<256x128xbf16>, vector<16x128xf32> -> vector<16x128xf32>
    %c0_59 = arith.constant 0 : index
    %c0_60 = arith.constant 0 : index
    %c0_61 = arith.constant 0 : index
    %135 = vector.load %arg13[%c0_59, %c0_60, %c0_61] : memref<2x1x128xf32, #tpu.memory_space<vmem>>, vector<1x1x128xf32>
    %136 = vector.shape_cast %135 : vector<1x1x128xf32> to vector<1x128xf32>
    %137 = vector.broadcast %136 : vector<1x128xf32> to vector<16x128xf32>
    %138 = arith.addf %134, %137 : vector<16x128xf32>
    %139 = arith.addf %109, %138 : vector<16x128xf32>
    %c0_62 = arith.constant 0 : index
    %c0_63 = arith.constant 0 : index
    %c0_64 = arith.constant 0 : index
    %140 = vector.load %arg14[%c0_62, %c0_63, %c0_64] : memref<2x1x128xf32, #tpu.memory_space<vmem>>, vector<1x1x128xf32>
    %141 = vector.shape_cast %140 : vector<1x1x128xf32> to vector<1x128xf32>
    %c0_65 = arith.constant 0 : index
    %c0_66 = arith.constant 0 : index
    %c0_67 = arith.constant 0 : index
    %142 = vector.load %arg15[%c0_65, %c0_66, %c0_67] : memref<2x1x128xf32, #tpu.memory_space<vmem>>, vector<1x1x128xf32>
    %143 = vector.shape_cast %142 : vector<1x1x128xf32> to vector<1x128xf32>
    %cst_68 = arith.constant dense<0.000000e+00> : vector<16xf32>
    %144 = vector.multi_reduction <add>, %139, %cst_68 [1] : vector<16x128xf32> to vector<16xf32>
    %145 = vector.shape_cast %144 : vector<16xf32> to vector<16x1xf32>
    %cst_69 = arith.constant 1.280000e+02 : f32
    %146 = vector.broadcast %cst_69 : f32 to vector<16x1xf32>
    %147 = arith.divf %145, %146 : vector<16x1xf32>
    %148 = vector.broadcast %147 : vector<16x1xf32> to vector<16x128xf32>
    %149 = arith.subf %139, %148 : vector<16x128xf32>
    %150 = arith.mulf %149, %149 : vector<16x128xf32>
    %cst_70 = arith.constant dense<0.000000e+00> : vector<16xf32>
    %151 = vector.multi_reduction <add>, %150, %cst_70 [1] : vector<16x128xf32> to vector<16xf32>
    %152 = vector.shape_cast %151 : vector<16xf32> to vector<16x1xf32>
    %cst_71 = arith.constant 1.280000e+02 : f32
    %153 = vector.broadcast %cst_71 : f32 to vector<16x1xf32>
    %154 = arith.divf %152, %153 : vector<16x1xf32>
    %155 = vector.broadcast %147 : vector<16x1xf32> to vector<16x128xf32>
    %156 = arith.subf %139, %155 : vector<16x128xf32>
    %cst_72 = arith.constant 9.99999996E-13 : f32
    %157 = vector.broadcast %cst_72 : f32 to vector<16x1xf32>
    %158 = arith.addf %154, %157 : vector<16x1xf32>
    %159 = math.rsqrt %158 : vector<16x1xf32>
    %160 = vector.broadcast %159 : vector<16x1xf32> to vector<16x128xf32>
    %161 = arith.mulf %156, %160 : vector<16x128xf32>
    %162 = vector.broadcast %141 : vector<1x128xf32> to vector<16x128xf32>
    %163 = arith.mulf %161, %162 : vector<16x128xf32>
    %164 = vector.broadcast %143 : vector<1x128xf32> to vector<16x128xf32>
    %165 = arith.addf %163, %164 : vector<16x128xf32>
    %166 = arith.truncf %165 : vector<16x128xf32> to vector<16x128xbf16>
    %c1 = arith.constant 1 : index
    %c0_73 = arith.constant 0 : index
    %c0_74 = arith.constant 0 : index
    %167 = vector.load %arg4[%c1, %c0_73, %c0_74] : memref<2x128x384xbf16, #tpu.memory_space<vmem>>, vector<1x128x384xbf16>
    %168 = vector.shape_cast %167 : vector<1x128x384xbf16> to vector<128x384xbf16>
    %cst_75 = arith.constant dense<0.000000e+00> : vector<16x384xf32>
    %169 = tpu.matmul %166, %168, %cst_75 {dimension_numbers = #tpu.dot_dimension_numbers<[1], [0], [0], [1], [0, 0, 1, 1], [], []>} : vector<16x128xbf16>, vector<128x384xbf16>, vector<16x384xf32> -> vector<16x384xf32>
    %c1_76 = arith.constant 1 : index
    %c0_77 = arith.constant 0 : index
    %c0_78 = arith.constant 0 : index
    %170 = vector.load %arg5[%c1_76, %c0_77, %c0_78] : memref<2x1x384xf32, #tpu.memory_space<vmem>>, vector<1x1x384xf32>
    %171 = vector.shape_cast %170 : vector<1x1x384xf32> to vector<1x384xf32>
    %172 = vector.broadcast %171 : vector<1x384xf32> to vector<16x384xf32>
    %173 = arith.addf %169, %172 : vector<16x384xf32>
    %174 = vector.extract_strided_slice %173 {offsets = [0, 0], sizes = [16, 64], strides = [1, 1]} : vector<16x384xf32> to vector<16x64xf32>
    %175 = arith.truncf %174 : vector<16x64xf32> to vector<16x64xbf16>
    %176 = vector.extract_strided_slice %173 {offsets = [0, 128], sizes = [16, 64], strides = [1, 1]} : vector<16x384xf32> to vector<16x64xf32>
    %177 = arith.truncf %176 : vector<16x64xf32> to vector<16x64xbf16>
    %178 = vector.extract_strided_slice %173 {offsets = [0, 256], sizes = [16, 64], strides = [1, 1]} : vector<16x384xf32> to vector<16x64xf32>
    %179 = arith.truncf %178 : vector<16x64xf32> to vector<16x64xbf16>
    %cst_79 = arith.constant dense<0.000000e+00> : vector<16x16xf32>
    %180 = tpu.matmul %175, %177, %cst_79 {dimension_numbers = #tpu.dot_dimension_numbers<[1], [1], [0], [0], [0, 0, 1, 0], [], []>} : vector<16x64xbf16>, vector<16x64xbf16>, vector<16x16xf32> -> vector<16x16xf32>
    %181 = arith.addf %180, %25 : vector<16x16xf32>
    %cst_80 = arith.constant dense<0xFF800000> : vector<16xf32>
    %182 = vector.multi_reduction <maximumf>, %181, %cst_80 [1] : vector<16x16xf32> to vector<16xf32>
    %183 = vector.shape_cast %182 : vector<16xf32> to vector<16x1xf32>
    %184 = vector.broadcast %183 : vector<16x1xf32> to vector<16x16xf32>
    %185 = arith.subf %181, %184 : vector<16x16xf32>
    %186 = math.exp %185 : vector<16x16xf32>
    %cst_81 = arith.constant dense<0.000000e+00> : vector<16xf32>
    %187 = vector.multi_reduction <add>, %186, %cst_81 [1] : vector<16x16xf32> to vector<16xf32>
    %188 = vector.shape_cast %187 : vector<16xf32> to vector<16x1xf32>
    %189 = tpu.reciprocal %188 {approx = true} : vector<16x1xf32> -> vector<16x1xf32>
    %190 = vector.broadcast %189 : vector<16x1xf32> to vector<16x16xf32>
    %191 = arith.mulf %186, %190 : vector<16x16xf32>
    %192 = arith.truncf %191 : vector<16x16xf32> to vector<16x16xbf16>
    %cst_82 = arith.constant dense<0.000000e+00> : vector<16x64xf32>
    %193 = tpu.matmul %192, %179, %cst_82 {dimension_numbers = #tpu.dot_dimension_numbers<[1], [0], [0], [1], [0, 0, 1, 1], [], []>} : vector<16x16xbf16>, vector<16x64xbf16>, vector<16x64xf32> -> vector<16x64xf32>
    %194 = vector.extract_strided_slice %173 {offsets = [0, 64], sizes = [16, 64], strides = [1, 1]} : vector<16x384xf32> to vector<16x64xf32>
    %195 = arith.truncf %194 : vector<16x64xf32> to vector<16x64xbf16>
    %196 = vector.extract_strided_slice %173 {offsets = [0, 192], sizes = [16, 64], strides = [1, 1]} : vector<16x384xf32> to vector<16x64xf32>
    %197 = arith.truncf %196 : vector<16x64xf32> to vector<16x64xbf16>
    %198 = vector.extract_strided_slice %173 {offsets = [0, 320], sizes = [16, 64], strides = [1, 1]} : vector<16x384xf32> to vector<16x64xf32>
    %199 = arith.truncf %198 : vector<16x64xf32> to vector<16x64xbf16>
    %cst_83 = arith.constant dense<0.000000e+00> : vector<16x16xf32>
    %200 = tpu.matmul %195, %197, %cst_83 {dimension_numbers = #tpu.dot_dimension_numbers<[1], [1], [0], [0], [0, 0, 1, 0], [], []>} : vector<16x64xbf16>, vector<16x64xbf16>, vector<16x16xf32> -> vector<16x16xf32>
    %201 = arith.addf %200, %25 : vector<16x16xf32>
    %cst_84 = arith.constant dense<0xFF800000> : vector<16xf32>
    %202 = vector.multi_reduction <maximumf>, %201, %cst_84 [1] : vector<16x16xf32> to vector<16xf32>
    %203 = vector.shape_cast %202 : vector<16xf32> to vector<16x1xf32>
    %204 = vector.broadcast %203 : vector<16x1xf32> to vector<16x16xf32>
    %205 = arith.subf %201, %204 : vector<16x16xf32>
    %206 = math.exp %205 : vector<16x16xf32>
    %cst_85 = arith.constant dense<0.000000e+00> : vector<16xf32>
    %207 = vector.multi_reduction <add>, %206, %cst_85 [1] : vector<16x16xf32> to vector<16xf32>
    %208 = vector.shape_cast %207 : vector<16xf32> to vector<16x1xf32>
    %209 = tpu.reciprocal %208 {approx = true} : vector<16x1xf32> -> vector<16x1xf32>
    %210 = vector.broadcast %209 : vector<16x1xf32> to vector<16x16xf32>
    %211 = arith.mulf %206, %210 : vector<16x16xf32>
    %212 = arith.truncf %211 : vector<16x16xf32> to vector<16x16xbf16>
    %cst_86 = arith.constant dense<0.000000e+00> : vector<16x64xf32>
    %213 = tpu.matmul %212, %199, %cst_86 {dimension_numbers = #tpu.dot_dimension_numbers<[1], [0], [0], [1], [0, 0, 1, 1], [], []>} : vector<16x16xbf16>, vector<16x64xbf16>, vector<16x64xf32> -> vector<16x64xf32>
    %214 = tpu.concatenate %193, %213 in 1 : vector<16x64xf32>, vector<16x64xf32> -> vector<16x128xf32>
    %215 = arith.truncf %214 : vector<16x128xf32> to vector<16x128xbf16>
    %c1_87 = arith.constant 1 : index
    %c0_88 = arith.constant 0 : index
    %c0_89 = arith.constant 0 : index
    %216 = vector.load %arg6[%c1_87, %c0_88, %c0_89] : memref<2x128x128xbf16, #tpu.memory_space<vmem>>, vector<1x128x128xbf16>
    %217 = vector.shape_cast %216 : vector<1x128x128xbf16> to vector<128x128xbf16>
    %cst_90 = arith.constant dense<0.000000e+00> : vector<16x128xf32>
    %218 = tpu.matmul %215, %217, %cst_90 {dimension_numbers = #tpu.dot_dimension_numbers<[1], [0], [0], [1], [0, 0, 1, 1], [], []>} : vector<16x128xbf16>, vector<128x128xbf16>, vector<16x128xf32> -> vector<16x128xf32>
    %c1_91 = arith.constant 1 : index
    %c0_92 = arith.constant 0 : index
    %c0_93 = arith.constant 0 : index
    %219 = vector.load %arg7[%c1_91, %c0_92, %c0_93] : memref<2x1x128xf32, #tpu.memory_space<vmem>>, vector<1x1x128xf32>
    %220 = vector.shape_cast %219 : vector<1x1x128xf32> to vector<1x128xf32>
    %221 = vector.broadcast %220 : vector<1x128xf32> to vector<16x128xf32>
    %222 = arith.addf %218, %221 : vector<16x128xf32>
    %223 = arith.addf %165, %222 : vector<16x128xf32>
    %c1_94 = arith.constant 1 : index
    %c0_95 = arith.constant 0 : index
    %c0_96 = arith.constant 0 : index
    %224 = vector.load %arg8[%c1_94, %c0_95, %c0_96] : memref<2x1x128xf32, #tpu.memory_space<vmem>>, vector<1x1x128xf32>
    %225 = vector.shape_cast %224 : vector<1x1x128xf32> to vector<1x128xf32>
    %c1_97 = arith.constant 1 : index
    %c0_98 = arith.constant 0 : index
    %c0_99 = arith.constant 0 : index
    %226 = vector.load %arg9[%c1_97, %c0_98, %c0_99] : memref<2x1x128xf32, #tpu.memory_space<vmem>>, vector<1x1x128xf32>
    %227 = vector.shape_cast %226 : vector<1x1x128xf32> to vector<1x128xf32>
    %cst_100 = arith.constant dense<0.000000e+00> : vector<16xf32>
    %228 = vector.multi_reduction <add>, %223, %cst_100 [1] : vector<16x128xf32> to vector<16xf32>
    %229 = vector.shape_cast %228 : vector<16xf32> to vector<16x1xf32>
    %cst_101 = arith.constant 1.280000e+02 : f32
    %230 = vector.broadcast %cst_101 : f32 to vector<16x1xf32>
    %231 = arith.divf %229, %230 : vector<16x1xf32>
    %232 = vector.broadcast %231 : vector<16x1xf32> to vector<16x128xf32>
    %233 = arith.subf %223, %232 : vector<16x128xf32>
    %234 = arith.mulf %233, %233 : vector<16x128xf32>
    %cst_102 = arith.constant dense<0.000000e+00> : vector<16xf32>
    %235 = vector.multi_reduction <add>, %234, %cst_102 [1] : vector<16x128xf32> to vector<16xf32>
    %236 = vector.shape_cast %235 : vector<16xf32> to vector<16x1xf32>
    %cst_103 = arith.constant 1.280000e+02 : f32
    %237 = vector.broadcast %cst_103 : f32 to vector<16x1xf32>
    %238 = arith.divf %236, %237 : vector<16x1xf32>
    %239 = vector.broadcast %231 : vector<16x1xf32> to vector<16x128xf32>
    %240 = arith.subf %223, %239 : vector<16x128xf32>
    %cst_104 = arith.constant 9.99999996E-13 : f32
    %241 = vector.broadcast %cst_104 : f32 to vector<16x1xf32>
    %242 = arith.addf %238, %241 : vector<16x1xf32>
    %243 = math.rsqrt %242 : vector<16x1xf32>
    %244 = vector.broadcast %243 : vector<16x1xf32> to vector<16x128xf32>
    %245 = arith.mulf %240, %244 : vector<16x128xf32>
    %246 = vector.broadcast %225 : vector<1x128xf32> to vector<16x128xf32>
    %247 = arith.mulf %245, %246 : vector<16x128xf32>
    %248 = vector.broadcast %227 : vector<1x128xf32> to vector<16x128xf32>
    %249 = arith.addf %247, %248 : vector<16x128xf32>
    %250 = arith.truncf %249 : vector<16x128xf32> to vector<16x128xbf16>
    %c1_105 = arith.constant 1 : index
    %c0_106 = arith.constant 0 : index
    %c0_107 = arith.constant 0 : index
    %251 = vector.load %arg10[%c1_105, %c0_106, %c0_107] : memref<2x128x256xbf16, #tpu.memory_space<vmem>>, vector<1x128x256xbf16>
    %252 = vector.shape_cast %251 : vector<1x128x256xbf16> to vector<128x256xbf16>
    %cst_108 = arith.constant dense<0.000000e+00> : vector<16x256xf32>
    %253 = tpu.matmul %250, %252, %cst_108 {dimension_numbers = #tpu.dot_dimension_numbers<[1], [0], [0], [1], [0, 0, 1, 1], [], []>} : vector<16x128xbf16>, vector<128x256xbf16>, vector<16x256xf32> -> vector<16x256xf32>
    %c1_109 = arith.constant 1 : index
    %c0_110 = arith.constant 0 : index
    %c0_111 = arith.constant 0 : index
    %254 = vector.load %arg11[%c1_109, %c0_110, %c0_111] : memref<2x1x256xf32, #tpu.memory_space<vmem>>, vector<1x1x256xf32>
    %255 = vector.shape_cast %254 : vector<1x1x256xf32> to vector<1x256xf32>
    %256 = vector.broadcast %255 : vector<1x256xf32> to vector<16x256xf32>
    %257 = arith.addf %253, %256 : vector<16x256xf32>
    %258 = arith.mulf %257, %257 : vector<16x256xf32>
    %259 = arith.mulf %257, %258 : vector<16x256xf32>
    %cst_112 = arith.constant 4.471500e-02 : f32
    %260 = vector.broadcast %cst_112 : f32 to vector<16x256xf32>
    %261 = arith.mulf %260, %259 : vector<16x256xf32>
    %262 = arith.addf %257, %261 : vector<16x256xf32>
    %cst_113 = arith.constant 0.797884583 : f32
    %263 = vector.broadcast %cst_113 : f32 to vector<16x256xf32>
    %264 = arith.mulf %263, %262 : vector<16x256xf32>
    %265 = math.tanh %264 : vector<16x256xf32>
    %cst_114 = arith.constant 1.000000e+00 : f32
    %266 = vector.broadcast %cst_114 : f32 to vector<16x256xf32>
    %267 = arith.addf %266, %265 : vector<16x256xf32>
    %cst_115 = arith.constant 5.000000e-01 : f32
    %268 = vector.broadcast %cst_115 : f32 to vector<16x256xf32>
    %269 = arith.mulf %268, %267 : vector<16x256xf32>
    %270 = arith.mulf %257, %269 : vector<16x256xf32>
    %271 = arith.truncf %270 : vector<16x256xf32> to vector<16x256xbf16>
    %c1_116 = arith.constant 1 : index
    %c0_117 = arith.constant 0 : index
    %c0_118 = arith.constant 0 : index
    %272 = vector.load %arg12[%c1_116, %c0_117, %c0_118] : memref<2x256x128xbf16, #tpu.memory_space<vmem>>, vector<1x256x128xbf16>
    %273 = vector.shape_cast %272 : vector<1x256x128xbf16> to vector<256x128xbf16>
    %cst_119 = arith.constant dense<0.000000e+00> : vector<16x128xf32>
    %274 = tpu.matmul %271, %273, %cst_119 {dimension_numbers = #tpu.dot_dimension_numbers<[1], [0], [0], [1], [0, 0, 1, 1], [], []>} : vector<16x256xbf16>, vector<256x128xbf16>, vector<16x128xf32> -> vector<16x128xf32>
    %c1_120 = arith.constant 1 : index
    %c0_121 = arith.constant 0 : index
    %c0_122 = arith.constant 0 : index
    %275 = vector.load %arg13[%c1_120, %c0_121, %c0_122] : memref<2x1x128xf32, #tpu.memory_space<vmem>>, vector<1x1x128xf32>
    %276 = vector.shape_cast %275 : vector<1x1x128xf32> to vector<1x128xf32>
    %277 = vector.broadcast %276 : vector<1x128xf32> to vector<16x128xf32>
    %278 = arith.addf %274, %277 : vector<16x128xf32>
    %279 = arith.addf %249, %278 : vector<16x128xf32>
    %c1_123 = arith.constant 1 : index
    %c0_124 = arith.constant 0 : index
    %c0_125 = arith.constant 0 : index
    %280 = vector.load %arg14[%c1_123, %c0_124, %c0_125] : memref<2x1x128xf32, #tpu.memory_space<vmem>>, vector<1x1x128xf32>
    %281 = vector.shape_cast %280 : vector<1x1x128xf32> to vector<1x128xf32>
    %c1_126 = arith.constant 1 : index
    %c0_127 = arith.constant 0 : index
    %c0_128 = arith.constant 0 : index
    %282 = vector.load %arg15[%c1_126, %c0_127, %c0_128] : memref<2x1x128xf32, #tpu.memory_space<vmem>>, vector<1x1x128xf32>
    %283 = vector.shape_cast %282 : vector<1x1x128xf32> to vector<1x128xf32>
    %cst_129 = arith.constant dense<0.000000e+00> : vector<16xf32>
    %284 = vector.multi_reduction <add>, %279, %cst_129 [1] : vector<16x128xf32> to vector<16xf32>
    %285 = vector.shape_cast %284 : vector<16xf32> to vector<16x1xf32>
    %cst_130 = arith.constant 1.280000e+02 : f32
    %286 = vector.broadcast %cst_130 : f32 to vector<16x1xf32>
    %287 = arith.divf %285, %286 : vector<16x1xf32>
    %288 = vector.broadcast %287 : vector<16x1xf32> to vector<16x128xf32>
    %289 = arith.subf %279, %288 : vector<16x128xf32>
    %290 = arith.mulf %289, %289 : vector<16x128xf32>
    %cst_131 = arith.constant dense<0.000000e+00> : vector<16xf32>
    %291 = vector.multi_reduction <add>, %290, %cst_131 [1] : vector<16x128xf32> to vector<16xf32>
    %292 = vector.shape_cast %291 : vector<16xf32> to vector<16x1xf32>
    %cst_132 = arith.constant 1.280000e+02 : f32
    %293 = vector.broadcast %cst_132 : f32 to vector<16x1xf32>
    %294 = arith.divf %292, %293 : vector<16x1xf32>
    %295 = vector.broadcast %287 : vector<16x1xf32> to vector<16x128xf32>
    %296 = arith.subf %279, %295 : vector<16x128xf32>
    %cst_133 = arith.constant 9.99999996E-13 : f32
    %297 = vector.broadcast %cst_133 : f32 to vector<16x1xf32>
    %298 = arith.addf %294, %297 : vector<16x1xf32>
    %299 = math.rsqrt %298 : vector<16x1xf32>
    %300 = vector.broadcast %299 : vector<16x1xf32> to vector<16x128xf32>
    %301 = arith.mulf %296, %300 : vector<16x128xf32>
    %302 = vector.broadcast %281 : vector<1x128xf32> to vector<16x128xf32>
    %303 = arith.mulf %301, %302 : vector<16x128xf32>
    %304 = vector.broadcast %283 : vector<1x128xf32> to vector<16x128xf32>
    %305 = arith.addf %303, %304 : vector<16x128xf32>
    %306 = vector.extract_strided_slice %305 {offsets = [0, 0], sizes = [1, 128], strides = [1, 1]} : vector<16x128xf32> to vector<1x128xf32>
    %c0_134 = arith.constant 0 : index
    %c0_135 = arith.constant 0 : index
    %307 = vector.load %arg16[%c0_134, %c0_135] : memref<2x128xf32, #tpu.memory_space<vmem>>, vector<1x128xf32>
    tpu.vector_store %arg16[%c0_134, %c0_135], %306 {strides = array<i32>} : memref<2x128xf32, #tpu.memory_space<vmem>>, vector<1x128xf32>,
    %308 = vector.extract_strided_slice %305 {offsets = [8, 0], sizes = [1, 128], strides = [1, 1]} : vector<16x128xf32> to vector<1x128xf32>
    %c1_136 = arith.constant 1 : index
    %c0_137 = arith.constant 0 : index
    %309 = vector.load %arg16[%c1_136, %c0_137] : memref<2x128xf32, #tpu.memory_space<vmem>>, vector<1x128xf32>
    tpu.vector_store %arg16[%c1_136, %c0_137], %308 {strides = array<i32>} : memref<2x128xf32, #tpu.memory_space<vmem>>, vector<1x128xf32>,
    return
  }
}

</mosaic_0001>

<bundles_post_ra>
// kernel: retriever_forward.1
= control target key start
LH: loop header
LB: loop body
LE: loop exit
PB: predicated region body
PF: predicated region fallthrough
CT: control target
= control target key end

     0   :  { %s3687_s0 = inlined_call_operand.vmem [shape: f32[16,128], index: 0, kind: input, shape index: {}]   ;;  %s3688_s1 = inlined_call_operand.vmem [shape: f32[16,16], index: 1, kind: input, shape index: {}]   ;;  %s3689_s2 = inlined_call_operand.hbm [shape: f32[1,128], index: 2, kind: input, shape index: {}]   ;;  %s3690_s3 = inlined_call_operand.hbm [shape: f32[1,128], index: 3, kind: input, shape index: {}]   ;;  %s3691_s4 = inlined_call_operand.hbm [shape: bf16[2,128,384], index: 4, kind: input, shape index: {}]   ;;  %s3692_s5 = inlined_call_operand.vmem [shape: f32[2,1,384], index: 5, kind: input, shape index: {}]   ;;  %s3693_s6 = inlined_call_operand.hbm [shape: bf16[2,128,128], index: 6, kind: input, shape index: {}]   ;;  %s3694_s7 = inlined_call_operand.vmem [shape: f32[2,1,128], index: 7, kind: input, shape index: {}]   ;;  %s3695_s8 = inlined_call_operand.vmem [shape: f32[2,1,128], index: 8, kind: input, shape index: {}]   ;;  %s3696_s9 = inlined_call_operand.vmem [shape: f32[2,1,128], index: 9, kind: input, shape index: {}]   ;;  %s3697_s10 = inlined_call_operand.vmem [shape: bf16[2,128,256], index: 10, kind: input, shape index: {}]   ;;  %s3698_s11 = inlined_call_operand.vmem [shape: f32[2,1,256], index: 11, kind: input, shape index: {}]   ;;  %s3699_s12 = inlined_call_operand.hbm [shape: bf16[2,256,128], index: 12, kind: input, shape index: {}]   ;;  %s3700_s13 = inlined_call_operand.vmem [shape: f32[2,1,128], index: 13, kind: input, shape index: {}]   ;;  %s3701_s14 = inlined_call_operand.vmem [shape: f32[2,1,128], index: 14, kind: input, shape index: {}]   ;;  %s3702_s15 = inlined_call_operand.vmem [shape: f32[2,1,128], index: 15, kind: input, shape index: {}]   ;;  %s3703_s16 = inlined_call_operand.hbm [shape: f32[2,128], index: 16, kind: output, shape index: {}]  }
   0x1   :  { %3705 = sst [smem:[#allocation16_spill]] %s3687_s0 }
   0x2   :  { %21 = vsyncpa [#allocation3], 0 }
   0x3   :  { %22 = vsyncpa [#allocation6], 0 }
   0x4   :  { %23 = vsyncpa [#allocation9], 0 }
   0x5   :  { %24 = vsyncpa [#allocation4], 0  ;;  %s3138_s21 = smov [#allocation5]   ;;  %s3139_s23 = smov [#allocation8]  }
   0x6   :  { %s45_s22 = sshll.u32 %s3138_s21, 4  ;;  %s68_s24 = sshll.u32 %s3139_s23, 4  ;;  %s46_s22 = int_to_ptr.vmem [resolvable:$true] %s45_s22  ;;  %s3236_s24 = int_to_ptr.vmem [resolvable:$true] %s68_s24 }
   0x7   :  { %s2998_s27 = scalar_lea.hbm %s3690_s3, 16 }
   0x8   :  { %p2999_p0 = scmp.ne.s32.totalorder %s3690_s3, %s2998_s27  ;;  %p3002_p1 = scmp.lt.u32.totalorder %s2998_s27, %s3690_s3 }
   0xa   :  { %p3004_p2 = pnand %p3002_p1, %p2999_p0 }
   0xc   :  { %3007 = shalt.err (!%p3004_p2)
}
   0xd   :  { %s3008_s17 = scalar_lea.vmem %s46_s22, 16  ;;  %s3012_s18 = scalar_lea.vmem %s46_s22, 32 }
   0xe   :  { %p3009_p3 = scmp.ne.s32.totalorder %s46_s22, %s3008_s17  ;;  %p3013_p4 = scmp.lt.s32.totalorder %s46_s22, %s46_s22 }
   0xf   :  { %p3014_p5 = scmp.lt.s32.totalorder %s3012_s18, %s3008_s17 }
  0x11   :  { %p3015_p6 = por %p3014_p5, %p3013_p4 }
  0x13   :  { %p3016_p7 = pnand %p3015_p6, %p3009_p3 }
  0x15   :  { %3019 = shalt.err (!%p3016_p7)
}
  0x16   :  { %48 = dma.hbm_to_vmem [thread:$0]  %s3690_s3, 16, %s46_s22, [#allocation6]  }
  0x17   :  { %s3020_s25 = scalar_lea.hbm %s3693_s6, 2048 }
  0x18   :  { %p3021_p8 = scmp.ne.s32.totalorder %s3693_s6, %s3020_s25  ;;  %p3024_p9 = scmp.lt.u32.totalorder %s3020_s25, %s3693_s6 }
  0x1a   :  { %p3026_p10 = pnand %p3024_p9, %p3021_p8 }
  0x1c   :  { %3029 = shalt.err (!%p3026_p10)
}
  0x1d   :  { %s3030_s30 = scalar_lea.vmem %s3236_s24, 2048  ;;  %p3035_p12 = scmp.lt.s32.totalorder %s3236_s24, %s3236_s24 }
  0x1e   :  { %p3031_p11 = scmp.ne.s32.totalorder %s3236_s24, %s3030_s30  ;;  %p3036_p13 = scmp.lt.s32.totalorder %s3030_s30, %s3030_s30 }
  0x20   :  { %p3037_p0 = por %p3036_p13, %p3035_p12 }
  0x22   :  { %p3038_p1 = pnand %p3037_p0, %p3031_p11 }
  0x24   :  { %3041 = shalt.err (!%p3038_p1)
}
  0x25   :  { %s3140_s3 = smov 64   ;;  %s3141_s22 = smov 4  }
  0x26   :  { %74 = dma.hbm_to_vmem [thread:$0]  %s3693_s6, 2048, %s3236_s24, [#allocation9], %s3140_s3, %s3140_s3, %s3141_s22  }
  0x27   :  { %s3142_s18 = smov [#allocation2]   ;;  %s3143_s20 = smov [#allocation7]  }
  0x28   :  { %s35_s19 = sshll.u32 %s3142_s18, 4  ;;  %s54_s21 = sshll.u32 %s3143_s20, 4  ;;  %s36_s19 = int_to_ptr.vmem [resolvable:$true] %s35_s19  ;;  %s3270_s21 = int_to_ptr.vmem [resolvable:$true] %s54_s21 }
  0x29   :  { %s3042_s26 = scalar_lea.hbm %s3689_s2, 16 }
  0x2a   :  { %p3043_p2 = scmp.ne.s32.totalorder %s3689_s2, %s3042_s26  ;;  %p3046_p3 = scmp.lt.u32.totalorder %s3042_s26, %s3689_s2 }
  0x2c   :  { %p3048_p4 = pnand %p3046_p3, %p3043_p2 }
  0x2e   :  { %3051 = shalt.err (!%p3048_p4)
}
  0x2f   :  { %s3052_s6 = scalar_lea.vmem %s36_s19, 16  ;;  %s3056_s24 = scalar_lea.vmem %s36_s19, 32 }
  0x30   :  { %p3053_p5 = scmp.ne.s32.totalorder %s36_s19, %s3052_s6  ;;  %p3057_p6 = scmp.lt.s32.totalorder %s36_s19, %s36_s19 }
  0x31   :  { %p3058_p7 = scmp.lt.s32.totalorder %s3056_s24, %s3052_s6 }
  0x33   :  { %p3059_p8 = por %p3058_p7, %p3057_p6 }
  0x35   :  { %p3060_p9 = pnand %p3059_p8, %p3053_p5 }
  0x37   :  { %3063 = shalt.err (!%p3060_p9)
}
  0x38   :  { %38 = dma.hbm_to_vmem [thread:$0]  %s3689_s2, 16, %s36_s19, [#allocation3]  }
  0x39   :  { %s3064_s23 = scalar_lea.hbm %s3691_s4, 6144 }
  0x3a   :  { %p3065_p10 = scmp.ne.s32.totalorder %s3691_s4, %s3064_s23  ;;  %p3068_p11 = scmp.lt.u32.totalorder %s3064_s23, %s3691_s4 }
  0x3c   :  { %p3070_p12 = pnand %p3068_p11, %p3065_p10 }
  0x3e   :  { %3073 = shalt.err (!%p3070_p12)
}
  0x3f   :  { %s3074_s29 = scalar_lea.vmem %s3270_s21, 6144  ;;  %p3079_p0 = scmp.lt.s32.totalorder %s3270_s21, %s3270_s21 }
  0x40   :  { %p3075_p13 = scmp.ne.s32.totalorder %s3270_s21, %s3074_s29  ;;  %p3080_p1 = scmp.lt.s32.totalorder %s3074_s29, %s3074_s29 }
  0x42   :  { %p3081_p2 = por %p3080_p1, %p3079_p0 }
  0x44   :  { %p3082_p3 = pnand %p3081_p2, %p3075_p13 }
  0x46   :  { %3085 = shalt.err (!%p3082_p3)
}
  0x47   :  { %s3144_s2 = smov 192   ;;  %s3145_s19 = smov 12  }
  0x48   :  { %60 = dma.hbm_to_vmem [thread:$0]  %s3691_s4, 6144, %s3270_s21, [#allocation6], %s3144_s2, %s3144_s2, %s3145_s19  }
  0x49   :  { %s3146_s24 = smov [#allocation10]   ;;  %s3086_s20 = scalar_lea.hbm %s3699_s12, 4096 }
  0x4a   :  { %s90_s0 = sshll.u32 %s3146_s24, 4  ;;  %p3087_p4 = scmp.ne.s32.totalorder %s3699_s12, %s3086_s20  ;;  %s91_s0 = int_to_ptr.vmem [resolvable:$true] %s90_s0 }
  0x4b   :  { %p3090_p5 = scmp.lt.u32.totalorder %s3086_s20, %s3699_s12 }
  0x4d   :  { %p3092_p6 = pnand %p3090_p5, %p3087_p4 }
  0x4f   :  { %3095 = shalt.err (!%p3092_p6)
}
  0x50   :  { %s3096_s28 = scalar_lea.vmem %s91_s0, 4096  ;;  %p3101_p8 = scmp.lt.s32.totalorder %s91_s0, %s91_s0 }
  0x51   :  { %p3097_p7 = scmp.ne.s32.totalorder %s91_s0, %s3096_s28  ;;  %p3102_p9 = scmp.lt.s32.totalorder %s3096_s28, %s3096_s28 }
  0x53   :  { %p3103_p10 = por %p3102_p9, %p3101_p8 }
  0x55   :  { %p3104_p11 = pnand %p3103_p10, %p3097_p7 }
  0x57   :  { %3107 = shalt.err (!%p3104_p11)
}
  0x58   :  { %96 = dma.hbm_to_vmem [thread:$0]  %s3699_s12, 4096, %s91_s0, [#allocation9], %s3140_s3, %s3140_s3, %s3141_s22  }
  0x59   :  { %3130 = dma.done.wait [#allocation3], 16  }
  0x5a   :  { %3131 = vsyncadd [#allocation3], 4294967280 }
  0x5b   :  { %3132 = dma.done.wait [#allocation6], 6160  }
  0x5c   :  { %3133 = vsyncadd [#allocation6], 4294961136 }
  0x5d   :  { %3134 = dma.done.wait [#allocation9], 6144  }
  0x5e   :  { %3135 = vsyncadd [#allocation9], 4294961152  ;;  %s3706_s19 = sld [smem:[#allocation16_spill]]  ;;  %v2770_v2 = vld [vmem:[#allocation7 + $0x4] ss:$12 sps:$4 sm:$0xff]   ;;  %v3147_v4 = vmov 0.0   ;;  %v199_v53 = vlaneseq }
  0x5f   :  { %v2772_v3 = vld [vmem:[#allocation7] ss:$12 sps:$4 sm:$0xff]   ;;  %2619 = vmatprep.subr.bf16.mxu1 %v3147_v4  ;;  %v2773_v5 = vld [vmem:[#allocation7 + $0x8] ss:$12 sps:$4 sm:$0xff]   ;;  %342 = vmatprep.subr.bf16.mxu0 %v2770_v2  ;;  %v2776_v15 = vld [vmem:[#allocation7 + $0x18] ss:$12 sps:$4 sm:$0xff]  }
  0x60   :  { %v2774_v6 = vld [vmem:[#allocation7 + $0x1c] ss:$12 sps:$4 sm:$0xff]   ;;  %343 = vmatpush1.bf16.msra.mxu0 %v2772_v3  ;;  %2620 = vmatpush3.bf16.msra.mxu1 %v2773_v5  ;;  %v2777_v16 = vld [vmem:[#allocation7 + $0x20] ss:$12 sps:$4 sm:$0xff]   ;;  %v2781_v19 = vld [vmem:[#allocation7 + $0x38] ss:$12 sps:$4 sm:$0xff]  }
  0x61   :  { %344 = vmatprep.subr.bf16.mxu0 %v2774_v6  ;;  %2621 = vmatprep.subr.bf16.mxu1 %v3147_v4  ;;  %v2778_v17 = vld [vmem:[#allocation7 + $0x34] ss:$12 sps:$4 sm:$0xff]   ;;  %v2780_v18 = vld [vmem:[#allocation7 + $0x30] ss:$12 sps:$4 sm:$0xff]   ;;  %v2782_v20 = vld [vmem:[#allocation7 + $0x4c] ss:$12 sps:$4 sm:$0xff]  }
  0x62   :  { %v2784_v21 = vld [vmem:[#allocation7 + $0x48] ss:$12 sps:$4 sm:$0xff]   ;;  %v2785_v22 = vld [vmem:[#allocation7 + $0x50] ss:$12 sps:$4 sm:$0xff]   ;;  %v2788_v24 = vld [vmem:[#allocation7 + $0x60] ss:$12 sps:$4 sm:$0xff]  }
  0x63   :  { %v2786_v23 = vld [vmem:[#allocation7 + $0x64] ss:$12 sps:$4 sm:$0xff]   ;;  %v2789_v25 = vld [vmem:[#allocation7 + $0x68] ss:$12 sps:$4 sm:$0xff]   ;;  %v2793_v28 = vld [vmem:[#allocation7 + $0x80] ss:$12 sps:$4 sm:$0xff]  }
  0x64   :  { %v119_v0 = vld [vmem:[%s3706_s19] sm:$0xff]  ;;  %v120_v1 = vld [vmem:[%s3706_s19 + $0x8] sm:$0xff]  ;;  %345 = vmatpush1.bf16.msra.mxu0 %v2776_v15  ;;  %2622 = vmatpush3.bf16.msra.mxu1 %v2777_v16  ;;  %v3148_v30 = vmov 0   ;;  %vm3149_vm0 = vmmov 0   ;;  %v2798_v33 = vld [vmem:[#allocation7 + $0xac] ss:$12 sps:$4 sm:$0xff]  }
  0x65   :  { %123 = vadd.xlane.f32.xlu0 %v119_v0  ;;  %2623 = vmatprep.subr.bf16.mxu1 %v3147_v4  ;;  %v2790_v26 = vld [vmem:[#allocation7 + $0x7c] ss:$12 sps:$4 sm:$0xff]   ;;  %v2792_v27 = vld [vmem:[#allocation7 + $0x78] ss:$12 sps:$4 sm:$0xff]   ;;  %v2794_v29 = vld [vmem:[#allocation7 + $0x94] ss:$12 sps:$4 sm:$0xff]  }
  0x66   :  { %346 = vmatprep.subr.bf16.mxu0 %v2778_v17  ;;  %374 = vmatprep.mubr.bf16.mxu0 %v3148_v30  ;;  %v2796_v31 = vld [vmem:[#allocation7 + $0x90] ss:$12 sps:$4 sm:$0xff]   ;;  %v2797_v32 = vld [vmem:[#allocation7 + $0x98] ss:$12 sps:$4 sm:$0xff]   ;;  %v2800_v34 = vld [vmem:[#allocation7 + $0xa8] ss:$12 sps:$4 sm:$0xff]  }
  0x67   :  { %2635 = vmatprep.mubr.msk.bf16.mxu1 %vm3149_vm0, %v3147_v4  ;;  %v2801_v35 = vld [vmem:[#allocation7 + $0xb0] ss:$12 sps:$4 sm:$0xff]   ;;  %v3355_v54 = vshrl.u32 %v199_v53, 7  ;;  %vm429_vm1 = vcmask 523264   ;;  %vm477_vm2 = vcmask 130048   ;;  %s3150_s25 = smov [#allocation11]  }
  0x68   :  { %347 = vmatpush1.bf16.msra.mxu0 %v2780_v18  ;;  %2624 = vmatpush3.bf16.msra.mxu1 %v2781_v19  ;;  %v2349_v44 = vld [vmem:[#allocation2] ss:$0 sm:$0xff]  ;;  %v2350_v48 = vld [vmem:[#allocation5] ss:$0 sm:$0xff]  ;;  %v3388_v19 = vld [vmem:[%s3688_s1 + $0x8] sm:$0xff]  ;;  %s2338_s26 = sshll.u32 %s3150_s25, 4  ;;  %s2339_s26 = int_to_ptr.vmem [resolvable:$true] %s2338_s26 }
  0x69   :  { %125 = vadd.xlane.f32.xlu0 %v120_v1  ;;  %2625 = vmatprep.subr.bf16.mxu1 %v3147_v4  ;;  %v3358_v55 = vsub.s32 0, %v3355_v54  ;;  %v209_v56 = vsub.s32 2, %v3355_v54  ;;  %v197_v57 = vld [vmem:[%s3692_s5] sm:$0x7]  ;;  %v3365_v58 = vsub.s32 1, %v3355_v54  ;;  %s3108_s27 = scalar_lea.vmem %s2339_s26, 32  ;;  %p3113_p13 = scmp.lt.s32.totalorder %s2339_s26, %s2339_s26 }
  0x6a   :  { %348 = vmatprep.subr.bf16.mxu0 %v2782_v20  ;;  %v3383_v17 = vld [vmem:[%s3688_s1] sm:$0xff]  ;;  %p3109_p12 = scmp.ne.s32.totalorder %s2339_s26, %s3108_s27  ;;  %p3114_p0 = scmp.lt.s32.totalorder %s3108_s27, %s3108_s27 }
  0x6b   :  { %v202_v59 = vrot.slane %v197_v57, %v3358_v55  ;;  %v210_v60 = vrot.slane %v197_v57, %v209_v56  ;;  %v206_v63 = vrot.slane %v197_v57, %v3365_v58 }
  0x6c   :  { %349 = vmatpush1.bf16.msra.mxu0 %v2784_v21  ;;  %2626 = vmatpush3.bf16.msra.mxu1 %v2785_v22  ;;  %p3115_p1 = por %p3114_p0, %p3113_p13 }
  0x6d   :  { %2627 = vmatprep.subr.bf16.mxu1 %v3147_v4  ;;  %350 = vmatprep.subr.bf16.mxu0 %v2786_v23 }
  0x6e   :  { %p3116_p2 = pnand %p3115_p1, %p3109_p12 }
  0x70   :  { %351 = vmatpush1.bf16.msra.mxu0 %v2788_v24  ;;  %2628 = vmatpush3.bf16.msra.mxu1 %v2789_v25 }
  0x71   :  { %352 = vmatprep.subr.bf16.mxu0 %v2790_v26  ;;  %2629 = vmatprep.subr.bf16.mxu1 %v3147_v4 }
  0x74   :  { %353 = vmatpush1.bf16.msra.mxu0 %v2792_v27  ;;  %2630 = vmatpush3.bf16.msra.mxu1 %v2793_v28 }
  0x75   :  { %354 = vmatprep.subr.bf16.mxu0 %v2794_v29  ;;  %2631 = vmatprep.subr.bf16.mxu1 %v3147_v4 }
  0x78   :  { %355 = vmatpush1.bf16.msra.mxu0 %v2796_v31  ;;  %2632 = vmatpush3.bf16.msra.mxu1 %v2797_v32 }
  0x79   :  { %356 = vmatprep.subr.bf16.mxu0 %v2798_v33  ;;  %2633 = vmatprep.subr.bf16.mxu1 %v3147_v4 }
  0x7c   :  { %357 = vmatpush1.bf16.msra.mxu0 %v2800_v34  ;;  %2634 = vmatpush3.bf16.msra.mxu1 %v2801_v35 }
  0x7d   :  { %2639 = vmatprep.subr.bf16.mxu1 %v3147_v4  ;;  %2663 = vmatprep.subr.bf16.mxu0 %v3147_v4 }
  0xf2   :  { %v124_v7 = vpop.xlane.xlu0 %123 }
  0xf3   :  { %v128_v8 = vmul.f32 0.0078125, %v124_v7 }
  0xf5   :  { %v3324_v9 = vsub.f32 %v119_v0, %v128_v8 }
  0xf6   :  { %v126_v10 = vpop.xlane.xlu0 %125 }
  0xf7   :  { %v129_v11 = vmul.f32 0.0078125, %v126_v10  ;;  %v132_v12 = vmul.f32 %v3324_v9, %v3324_v9 }
  0xf9   :  { %v3328_v13 = vsub.f32 %v120_v1, %v129_v11  ;;  %134 = vadd.xlane.f32.xlu1 %v132_v12 }
  0xfb   :  { %v133_v14 = vmul.f32 %v3328_v13, %v3328_v13 }
  0xfd   :  { %136 = vadd.xlane.f32.xlu1 %v133_v14 }
 0x186   :  { %v135_v36 = vpop.xlane.xlu1 %134 }
 0x187   :  { %v138_v37 = vmul.f32 0.0078125, %v135_v36 }
 0x189   :  { %v140_v38 = vadd.f32 1e-12, %v138_v37 }
 0x18a   :  { %v137_v39 = vpop.xlane.xlu1 %136 }
 0x18b   :  { %2930 = vrsqrt.f32 %v140_v38  ;;  %v139_v40 = vmul.f32 0.0078125, %v137_v39 }
 0x18d   :  { %v141_v41 = vadd.f32 1e-12, %v139_v40 }
 0x18f   :  { %2932 = vrsqrt.f32 %v141_v41 }
 0x195   :  { %v2931_v42 = vpop.eup %2930 }
 0x196   :  { %v144_v43 = vmul.f32 %v2931_v42, %v3324_v9 }
 0x198   :  { %v152_v47 = vmul.f32 %v2349_v44, %v144_v43 }
 0x199   :  { %v2933_v45 = vpop.eup %2932 }
 0x19a   :  { %v145_v46 = vmul.f32 %v2933_v45, %v3328_v13  ;;  %v3345_v50 = vadd.f32 %v2350_v48, %v152_v47 }
 0x19c   :  { %v153_v49 = vmul.f32 %v2349_v44, %v145_v46 }
 0x19e   :  { %v3347_v51 = vadd.f32 %v2350_v48, %v153_v49 }
 0x1a0   :  { %v164_v52 = vpack.c.bf16 %v3347_v51, %v3345_v50 }
 0x1a2   :  { %375 = vmatmul.mubr.bf16.vlgmr.msra.gmra.mrb[0].mxu0 %v164_v52  ;;  %2636 = vmatmul.mubr.bf16.vlgmr.msra.gmra.mrb[0].mxu1 %v164_v52 }
 0x1a3   :  { %2641 = vmatprep.mubr.msk.bf16.mxu1 %vm3149_vm0, %v3147_v4  ;;  %2679 = vmatprep.mubr.msk.bf16.mxu0 %vm3149_vm0, %v3147_v4 }
 0x275   :  { %v376_v61 = vpop.f32.mrb[0].mxu0  ;;  %v419_v62 = vpop.f32.mrb[0].mxu1 }
 0x276   :  { %v378_v0 = vpop.f32.mrb[1].mxu0  ;;  %v2637_v1 = vpop.f32.mrb[1].mxu1  ;;  %v377_v5 = vadd.f32 %v376_v61, %v202_v59  ;;  %v420_v6 = vadd.f32 %v419_v62, %v210_v60 }
 0x277   :  { %v380_v2 = vpop.f32.mrb[2].mxu0  ;;  %v422_v3 = vpop.f32.mrb[2].mxu1  ;;  %v379_v11 = vadd.f32 %v378_v0, %v206_v63 }
 0x278   :  { %v381_v7 = vadd.f32 %v380_v2, %v202_v59  ;;  %v423_v8 = vadd.f32 %v422_v3, %v210_v60  ;;  %v382_v9 = vpop.f32.mrb[3].mxu0  ;;  %v2638_v10 = vpop.f32.mrb[3].mxu1 }
 0x279   :  { %v383_v12 = vadd.f32 %v382_v9, %v206_v63 }
 0x27a   :  { %v426_v13 = vpack.c.bf16 %v381_v7, %v377_v5  ;;  %v3371_v14 = vpack.c.bf16 %v423_v8, %v420_v6 }
 0x27b   :  { %v427_v15 = vpack.c.bf16 %v383_v12, %v379_v11 }
 0x27d   :  { %v434_v16 = vsel %vm429_vm1, %v427_v15, 0 }
 0x27e   :  { %2640 = vmatpush3.bf16.xpose.msra.mxu1 %v434_v16 }
 0x27f   :  { %2645 = vmatprep.subr.bf16.mxu1 %v3147_v4 }
 0x285   :  { %2642 = vmatmul.mubr.msk.bf16.vlgmr.msra.gmra.mrb[4].mxu1 %vm429_vm1, %v426_v13 }
 0x286   :  { %2646 = vmatpush3.bf16.msra.mxu1 %v3371_v14  ;;  %2647 = vmatprep.mubr.msk.bf16.mxu1 %vm3149_vm0, %v3147_v4 }
 0x287   :  { %2651 = vmatprep.subr.bf16.mxu1 %v3147_v4 }
 0x358   :  { %v470_v18 = vpop.f32.mrb[4].mxu1 }
 0x359   :  { %v471_v20 = vadd.f32 %v470_v18, %v3383_v17  ;;  %v2643_v21 = vpop.f32.mrb[5].mxu1 }
 0x35a   :  { %v473_v22 = vpop.f32.mrb[6].mxu1 }
 0x35b   :  { %v474_v23 = vadd.f32 %v473_v22, %v3388_v19  ;;  %v2644_v24 = vpop.f32.mrb[7].mxu1  ;;  %v478_v25 = vsel %vm477_vm2, %v471_v20, -inf }
 0x35c   :  { %479 = vmax.xlane.f32.xlu0 %v478_v25  ;;  %v2802_v24 = vld [vmem:[#allocation8] sm:$0xff]   ;;  %v2803_v25 = vld [vmem:[#allocation8 + $0x8] sm:$0xff]  }
 0x35d   :  { %v481_v26 = vsel %vm477_vm2, %v474_v23, -inf  ;;  %2664 = vmatpush3.bf16.msra.mxu0 %v2802_v24 }
 0x35e   :  { %482 = vmax.xlane.f32.xlu1 %v481_v26  ;;  %2665 = vmatprep.subr.bf16.mxu0 %v3147_v4  ;;  %v2805_v26 = vld [vmem:[#allocation8 + $0x18] sm:$0xff]  }
 0x361   :  { %2666 = vmatpush3.bf16.msra.mxu0 %v2803_v25 }
 0x362   :  { %2667 = vmatprep.subr.bf16.mxu0 %v3147_v4 }
 0x3e9   :  { %v480_v27 = vpop.xlane.xlu0 %479 }
 0x3ea   :  { %v484_v28 = vsub.f32 %v471_v20, %v480_v27  ;;  %v2806_v27 = vld [vmem:[#allocation8 + $0x20] sm:$0xff]  }
 0x3eb   :  { %v483_v29 = vpop.xlane.xlu1 %482 }
 0x3ec   :  { %v486_v31 = vmul.f32 1.442695, %v484_v28  ;;  %v485_v32 = vsub.f32 %v474_v23, %v483_v29  ;;  %v2807_v28 = vld [vmem:[#allocation8 + $0x28] sm:$0xff]   ;;  %v2808_v29 = vld [vmem:[#allocation8 + $0x30] sm:$0xff]  }
 0x3ee   :  { %2934 = vpow2.f32 %v486_v31  ;;  %v488_v33 = vmul.f32 1.442695, %v485_v32  ;;  %v2809_v31 = vld [vmem:[#allocation8 + $0x38] sm:$0xff]  }
 0x3f0   :  { %2936 = vpow2.f32 %v488_v33 }
 0x3f8   :  { %v2935_v34 = vpop.eup %2934 }
 0x3f9   :  { %v490_v35 = vsel %vm477_vm2, %v2935_v34, 0.0 }
 0x3fa   :  { %v2937_v36 = vpop.eup %2936  ;;  %491 = vadd.xlane.f32.xlu0 %v490_v35 }
 0x3fb   :  { %v493_v37 = vsel %vm477_vm2, %v2937_v36, 0.0 }
 0x3fc   :  { %494 = vadd.xlane.f32.xlu1 %v493_v37 }
 0x40d   :  { %546 = vrot.lane.b32.xlu1 %v426_v13, %s3140_s3 }
 0x410   :  { %549 = vrot.lane.b32.xlu0 %v427_v15, %s3140_s3 }
 0x487   :  { %v492_v38 = vpop.xlane.xlu0 %491 }
 0x488   :  { %2938 = vrcp.f32 %v492_v38 }
 0x489   :  { %v495_v39 = vpop.xlane.xlu1 %494 }
 0x48a   :  { %2940 = vrcp.f32 %v495_v39 }
 0x48b   :  { %v550_v44 = vpop.permute.xlu0 %549 }
 0x48c   :  { %v555_v46 = vsel %vm429_vm1, %v550_v44, 0 }
 0x48d   :  { %v547_v47 = vpop.permute.xlu1 %546 }
 0x492   :  { %v2939_v40 = vpop.eup %2938 }
 0x493   :  { %v498_v42 = vmul.f32 %v2939_v40, %v2935_v34 }
 0x494   :  { %v2941_v41 = vpop.eup %2940 }
 0x495   :  { %v499_v43 = vmul.f32 %v2941_v41, %v2937_v36 }
 0x497   :  { %v500_v45 = vpack.c.bf16 %v499_v43, %v498_v42  ;;  %v2379_v43 = vld [vmem:[%s3694_s7] ss:$0 sm:$0xff] }
 0x499   :  { %2648 = vmatmul.mubr.msk.bf16.vlgmr.msra.gmra.mrb[8].mxu1 %vm477_vm2, %v500_v45 }
 0x49a   :  { %2652 = vmatpush3.bf16.xpose.msra.mxu1 %v555_v46  ;;  %2653 = vmatprep.mubr.msk.bf16.mxu1 %vm3149_vm0, %v3147_v4 }
 0x49b   :  { %2657 = vmatprep.subr.bf16.mxu1 %v3147_v4 }
 0x4a1   :  { %2654 = vmatmul.mubr.msk.bf16.vlgmr.msra.gmra.mrb[12].mxu1 %vm429_vm1, %v547_v47 }
 0x4a2   :  { %2659 = vmatprep.mubr.msk.bf16.mxu1 %vm3149_vm0, %v3147_v4 }
 0x56c   :  { %v3406_v48 = vpop.f32.mrb[8].mxu1 }
 0x56d   :  { %v2649_v49 = vpop.f32.mrb[9].mxu1 }
 0x56e   :  { %v3408_v52 = vpop.f32.mrb[10].mxu1 }
 0x56f   :  { %v2650_v53 = vpop.f32.mrb[11].mxu1 }
 0x574   :  { %v591_v57 = vpop.f32.mrb[12].mxu1 }
 0x575   :  { %v592_v59 = vadd.f32 %v591_v57, %v3383_v17  ;;  %v2655_v60 = vpop.f32.mrb[13].mxu1 }
 0x576   :  { %v594_v61 = vpop.f32.mrb[14].mxu1  ;;  %v2815_v60 = vld [vmem:[%s3697_s10 + $0x14] ss:$8 sps:$4 sm:$0xff]  }
 0x577   :  { %v595_v62 = vadd.f32 %v594_v61, %v3388_v19  ;;  %v2656_v63 = vpop.f32.mrb[15].mxu1  ;;  %v598_v0 = vsel %vm477_vm2, %v592_v59, -inf }
 0x578   :  { %599 = vmax.xlane.f32.xlu1 %v598_v0 }
 0x579   :  { %v601_v1 = vsel %vm477_vm2, %v595_v62, -inf }
 0x57a   :  { %602 = vmax.xlane.f32.xlu0 %v601_v1 }
 0x605   :  { %v600_v2 = vpop.xlane.xlu1 %599 }
 0x606   :  { %v604_v3 = vsub.f32 %v592_v59, %v600_v2  ;;  %v2812_v59 = vld [vmem:[%s3697_s10 + $0x4] ss:$8 sps:$4 sm:$0xff]  }
 0x607   :  { %v603_v5 = vpop.xlane.xlu0 %602 }
 0x608   :  { %v606_v6 = vmul.f32 1.442695, %v604_v3  ;;  %v605_v7 = vsub.f32 %v595_v62, %v603_v5  ;;  %v2818_v5 = vld [vmem:[%s3697_s10 + $0x24] ss:$8 sps:$4 sm:$0xff]  }
 0x60a   :  { %2942 = vpow2.f32 %v606_v6  ;;  %v608_v8 = vmul.f32 1.442695, %v605_v7  ;;  %v2816_v6 = vld [vmem:[%s3697_s10 + $0x20] ss:$8 sps:$4 sm:$0xff]   ;;  %v2821_v7 = vld [vmem:[%s3697_s10 + $0x34] ss:$8 sps:$4 sm:$0xff]  }
 0x60c   :  { %2944 = vpow2.f32 %v608_v8  ;;  %v2819_v8 = vld [vmem:[%s3697_s10 + $0x30] ss:$8 sps:$4 sm:$0xff]  }
 0x614   :  { %v2943_v9 = vpop.eup %2942 }
 0x615   :  { %v610_v10 = vsel %vm477_vm2, %v2943_v9, 0.0 }
 0x616   :  { %v2945_v11 = vpop.eup %2944  ;;  %611 = vadd.xlane.f32.xlu0 %v610_v10  ;;  %v2822_v10 = vld [vmem:[%s3697_s10 + $0x40] ss:$8 sps:$4 sm:$0xff]  }
 0x617   :  { %v613_v12 = vsel %vm477_vm2, %v2945_v11, 0.0 }
 0x618   :  { %614 = vadd.xlane.f32.xlu1 %v613_v12  ;;  %v2825_v12 = vld [vmem:[%s3697_s10 + $0x50] ss:$8 sps:$4 sm:$0xff]  }
 0x62c   :  { %622 = vrot.lane.b32.xlu0 %v3371_v14, %s3140_s3  ;;  %v2804_v14 = vld [vmem:[#allocation8 + $0x10] sm:$0xff]  }
 0x62d   :  { %2668 = vmatpush3.bf16.msra.mxu0 %v2804_v14 }
 0x62e   :  { %2669 = vmatprep.subr.bf16.mxu0 %v3147_v4 }
 0x631   :  { %2670 = vmatpush3.bf16.msra.mxu0 %v2805_v26  ;;  %v2388_v26 = vld [vmem:[%s3695_s8] ss:$0 sm:$0xff] }
 0x632   :  { %2671 = vmatprep.subr.bf16.mxu0 %v3147_v4 }
 0x635   :  { %2672 = vmatpush3.bf16.msra.mxu0 %v2806_v27 }
 0x636   :  { %2673 = vmatprep.subr.bf16.mxu0 %v3147_v4 }
 0x639   :  { %2674 = vmatpush3.bf16.msra.mxu0 %v2807_v28 }
 0x63a   :  { %2675 = vmatprep.subr.bf16.mxu0 %v3147_v4 }
 0x63d   :  { %2676 = vmatpush3.bf16.msra.mxu0 %v2808_v29 }
 0x63e   :  { %2677 = vmatprep.subr.bf16.mxu0 %v3147_v4 }
 0x641   :  { %2678 = vmatpush3.bf16.msra.mxu0 %v2809_v31 }
 0x6a3   :  { %v612_v13 = vpop.xlane.xlu0 %611 }
 0x6a4   :  { %2946 = vrcp.f32 %v612_v13  ;;  %v2830_v13 = vld [vmem:[%s3697_s10 + $0x64] ss:$8 sps:$4 sm:$0xff]  }
 0x6a5   :  { %v615_v15 = vpop.xlane.xlu1 %614 }
 0x6a6   :  { %2948 = vrcp.f32 %v615_v15  ;;  %v2828_v15 = vld [vmem:[%s3697_s10 + $0x60] ss:$8 sps:$4 sm:$0xff]  }
 0x6a7   :  { %v623_v16 = vpop.permute.xlu0 %622 }
 0x6a8   :  { %2658 = vmatpush3.bf16.msra.mxu1 %v623_v16  ;;  %v2833_v16 = vld [vmem:[%s3697_s10 + $0x74] ss:$8 sps:$4 sm:$0xff]  }
 0x6a9   :  { %943 = vmatprep.subr.bf16.mxu1 %v2812_v59  ;;  %v851_v59 = vld [vmem:[%s3698_s11] sm:$0x3] }
 0x6ae   :  { %v2947_v18 = vpop.eup %2946 }
 0x6af   :  { %v618_v21 = vmul.f32 %v2947_v18, %v2943_v9  ;;  %v2824_v9 = vld [vmem:[%s3697_s10 + $0x44] ss:$8 sps:$4 sm:$0xff]   ;;  %v2831_v18 = vld [vmem:[%s3697_s10 + $0x70] ss:$8 sps:$4 sm:$0xff]  }
 0x6b0   :  { %v2949_v20 = vpop.eup %2948 }
 0x6b1   :  { %v619_v22 = vmul.f32 %v2949_v20, %v2945_v11  ;;  %v2827_v11 = vld [vmem:[%s3697_s10 + $0x54] ss:$8 sps:$4 sm:$0xff]  }
 0x6b3   :  { %v620_v23 = vpack.c.bf16 %v619_v22, %v618_v21 }
 0x6b5   :  { %2660 = vmatmul.mubr.msk.bf16.vlgmr.msra.gmra.mrb[16].mxu1 %vm477_vm2, %v620_v23 }
 0x6b6   :  { %975 = vmatprep.mubr.bf16.mxu1 %v3148_v30 }
 0x788   :  { %v662_v32 = vpop.f32.mrb[16].mxu1 }
 0x789   :  { %v2661_v33 = vpop.f32.mrb[17].mxu1 }
 0x78a   :  { %v665_v34 = vpop.f32.mrb[18].mxu1 }
 0x78b   :  { %v2760_v35 = vpack.i.bf16 %v665_v34, %v662_v32  ;;  %v2662_v36 = vpop.f32.mrb[19].mxu1  ;;  %v2389_v32 = vld [vmem:[%s3696_s9] ss:$0 sm:$0xff] }
 0x78d   :  { %2761 = vrot.lane.b32.xlu1 %v2760_v35, %s3140_s3 }
 0x7ff   :  { %v2762_v37 = vpop.permute.xlu1 %2761 }
 0x800   :  { %v2764_v38 = vunpack.i.h.bf16 %v2762_v37  ;;  %v2763_v39 = vunpack.i.l.bf16 %v2762_v37  ;;  %v2834_v37 = vld [vmem:[#allocation10 + $0x40] sm:$0xff]  }
 0x801   :  { %2549 = vmatprep.subr.bf16.mxu0 %v2834_v37 }
 0x802   :  { %v678_v40 = vsel %vm429_vm1, %v3408_v52, %v2764_v38  ;;  %v677_v41 = vsel %vm429_vm1, %v3406_v48, %v2763_v39  ;;  %v2810_v48 = vld [vmem:[%s3697_s10] ss:$8 sps:$4 sm:$0xff]   ;;  %v2836_v39 = vld [vmem:[#allocation10 + $0x48] sm:$0xff]  }
 0x803   :  { %v679_v42 = vpack.c.bf16 %v678_v40, %v677_v41  ;;  %944 = vmatpush1.bf16.msra.mxu1 %v2810_v48  ;;  %v2835_v38 = vld [vmem:[#allocation10] sm:$0xff]   ;;  %v2837_v40 = vld [vmem:[#allocation10 + $0x8] sm:$0xff]   ;;  %v2838_v41 = vld [vmem:[#allocation10 + $0x50] sm:$0xff]  }
 0x804   :  { %945 = vmatprep.subr.bf16.mxu1 %v2815_v60  ;;  %v2849_v48 = vld [vmem:[#allocation10 + $0x38] sm:$0xff]   ;;  %v856_v60 = vrot.slane %v851_v59, %v3358_v55 }
 0x805   :  { %2680 = vmatmul.mubr.bf16.vlgmr.msra.gmra.mrb[4].mxu0 %v679_v42  ;;  %v2839_v42 = vld [vmem:[#allocation10 + $0x10] sm:$0xff]  }
 0x806   :  { %2550 = vmatpush3.bf16.msra.mxu0 %v2835_v38 }
 0x807   :  { %2551 = vmatprep.subr.bf16.mxu0 %v2836_v39 }
 0x80a   :  { %2552 = vmatpush3.bf16.msra.mxu0 %v2837_v40 }
 0x80b   :  { %2553 = vmatprep.subr.bf16.mxu0 %v2838_v41 }
 0x80e   :  { %2554 = vmatpush3.bf16.msra.mxu0 %v2839_v42 }
 0x8d8   :  { %v785_v44 = vpop.f32.mrb[4].mxu0 }
 0x8d9   :  { %v786_v45 = vadd.f32 %v2379_v43, %v785_v44  ;;  %v2681_v46 = vpop.f32.mrb[5].mxu0  ;;  %v2841_v44 = vld [vmem:[#allocation10 + $0x18] sm:$0xff]  }
 0x8da   :  { %v788_v47 = vpop.f32.mrb[6].mxu0  ;;  %v2843_v46 = vld [vmem:[#allocation10 + $0x20] sm:$0xff]  }
 0x8db   :  { %v789_v49 = vadd.f32 %v2379_v43, %v788_v47  ;;  %v2682_v53 = vpop.f32.mrb[7].mxu0  ;;  %v792_v57 = vadd.f32 %v786_v45, %v3345_v50  ;;  %v2813_v50 = vld [vmem:[%s3697_s10 + $0x10] ss:$8 sps:$4 sm:$0xff]   ;;  %v2840_v43 = vld [vmem:[#allocation10 + $0x58] sm:$0xff]   ;;  %v2842_v45 = vld [vmem:[#allocation10 + $0x60] sm:$0xff]  }
 0x8dc   :  { %946 = vmatpush1.bf16.msra.mxu1 %v2813_v50  ;;  %2555 = vmatprep.subr.bf16.mxu0 %v2840_v43  ;;  %v2844_v47 = vld [vmem:[#allocation10 + $0x68] sm:$0xff]   ;;  %v2846_v53 = vld [vmem:[#allocation10 + $0x70] sm:$0xff]   ;;  %v860_v50 = vrot.slane %v851_v59, %v3365_v58 }
 0x8dd   :  { %796 = vadd.xlane.f32.xlu1 %v792_v57  ;;  %v793_v52 = vadd.f32 %v789_v49, %v3347_v51  ;;  %947 = vmatprep.subr.bf16.mxu1 %v2818_v5  ;;  %v2845_v49 = vld [vmem:[#allocation10 + $0x28] sm:$0xff]  }
 0x8de   :  { %2556 = vmatpush3.bf16.msra.mxu0 %v2841_v44 }
 0x8df   :  { %798 = vadd.xlane.f32.xlu0 %v793_v52  ;;  %2557 = vmatprep.subr.bf16.mxu0 %v2842_v45 }
 0x8e0   :  { %948 = vmatpush1.bf16.msra.mxu1 %v2816_v6 }
 0x8e1   :  { %949 = vmatprep.subr.bf16.mxu1 %v2821_v7 }
 0x8e2   :  { %2558 = vmatpush3.bf16.msra.mxu0 %v2843_v46 }
 0x8e3   :  { %2559 = vmatprep.subr.bf16.mxu0 %v2844_v47 }
 0x8e4   :  { %950 = vmatpush1.bf16.msra.mxu1 %v2819_v8 }
 0x8e5   :  { %951 = vmatprep.subr.bf16.mxu1 %v2824_v9 }
 0x8e6   :  { %2560 = vmatpush3.bf16.msra.mxu0 %v2845_v49 }
 0x8e7   :  { %2561 = vmatprep.subr.bf16.mxu0 %v2846_v53  ;;  %v2406_v53 = vld [vmem:[%s3700_s13] ss:$0 sm:$0xff] }
 0x8e8   :  { %952 = vmatpush1.bf16.msra.mxu1 %v2822_v10 }
 0x8e9   :  { %953 = vmatprep.subr.bf16.mxu1 %v2827_v11 }
 0x8ec   :  { %954 = vmatpush1.bf16.msra.mxu1 %v2825_v12 }
 0x8ed   :  { %955 = vmatprep.subr.bf16.mxu1 %v2830_v13 }
 0x8f0   :  { %956 = vmatpush1.bf16.msra.mxu1 %v2828_v15 }
 0x8f1   :  { %957 = vmatprep.subr.bf16.mxu1 %v2833_v16 }
 0x8f4   :  { %958 = vmatpush1.bf16.msra.mxu1 %v2831_v18 }
 0x96a   :  { %v797_v51 = vpop.xlane.xlu1 %796 }
 0x96b   :  { %v800_v61 = vmul.f32 0.0078125, %v797_v51 }
 0x96c   :  { %v799_v62 = vpop.xlane.xlu0 %798 }
 0x96d   :  { %v802_v63 = vsub.f32 %v792_v57, %v800_v61  ;;  %v801_v0 = vmul.f32 0.0078125, %v799_v62  ;;  %v2847_v57 = vld [vmem:[#allocation10 + $0x30] sm:$0xff]  }
 0x96e   :  { %2562 = vmatpush3.bf16.msra.mxu0 %v2847_v57 }
 0x96f   :  { %v803_v1 = vsub.f32 %v793_v52, %v801_v0  ;;  %v804_v2 = vmul.f32 %v802_v63, %v802_v63  ;;  %v2848_v52 = vld [vmem:[#allocation10 + $0x78] sm:$0xff]  }
 0x970   :  { %2563 = vmatprep.subr.bf16.mxu0 %v2848_v52 }
 0x971   :  { %806 = vadd.xlane.f32.xlu0 %v804_v2  ;;  %v805_v3 = vmul.f32 %v803_v1, %v803_v1 }
 0x972   :  { %2564 = vmatpush3.bf16.msra.mxu0 %v2849_v48 }
 0x973   :  { %808 = vadd.xlane.f32.xlu1 %v805_v3  ;;  %2683 = vmatprep.subr.bf16.mxu0 %v3147_v4 }
 0x9fe   :  { %v807_v20 = vpop.xlane.xlu0 %806 }
 0x9ff   :  { %v810_v21 = vmul.f32 0.0078125, %v807_v20 }
 0xa00   :  { %v809_v22 = vpop.xlane.xlu1 %808 }
 0xa01   :  { %v812_v23 = vadd.f32 1e-12, %v810_v21  ;;  %v811_v24 = vmul.f32 0.0078125, %v809_v22 }
 0xa03   :  { %2950 = vrsqrt.f32 %v812_v23  ;;  %v813_v25 = vadd.f32 1e-12, %v811_v24 }
 0xa05   :  { %2952 = vrsqrt.f32 %v813_v25 }
 0xa0d   :  { %v2951_v14 = vpop.eup %2950 }
 0xa0e   :  { %v816_v27 = vmul.f32 %v2951_v14, %v802_v63 }
 0xa0f   :  { %v2953_v28 = vpop.eup %2952 }
 0xa10   :  { %v817_v29 = vmul.f32 %v2953_v28, %v803_v1  ;;  %v824_v31 = vmul.f32 %v2388_v26, %v816_v27 }
 0xa12   :  { %v825_v33 = vmul.f32 %v2388_v26, %v817_v29  ;;  %v3491_v34 = vadd.f32 %v2389_v32, %v824_v31 }
 0xa14   :  { %v3493_v35 = vadd.f32 %v2389_v32, %v825_v33 }
 0xa16   :  { %v834_v36 = vpack.c.bf16 %v3493_v35, %v3491_v34 }
 0xa18   :  { %976 = vmatmul.mubr.bf16.vlgmr.msra.gmra.mrb[20].mxu1 %v834_v36 }
 0xa19   :  { %1454 = vmatprep.mubr.bf16.mxu1 %v3148_v30 }
 0xaeb   :  { %v977_v51 = vpop.f32.mrb[20].mxu1 }
 0xaec   :  { %v978_v61 = vadd.f32 %v977_v51, %v856_v60  ;;  %v979_v62 = vpop.f32.mrb[21].mxu1 }
 0xaed   :  { %v980_v63 = vadd.f32 %v979_v62, %v860_v50  ;;  %v981_v0 = vpop.f32.mrb[22].mxu1 }
 0xaee   :  { %v986_v1 = vmul.f32 %v978_v61, %v978_v61  ;;  %v982_v2 = vadd.f32 %v981_v0, %v856_v60  ;;  %v983_v3 = vpop.f32.mrb[23].mxu1  ;;  %v2852_v0 = vld [vmem:[#allocation7 + $0xc4] ss:$12 sps:$4 sm:$0xff]  }
 0xaef   :  { %v987_v5 = vmul.f32 %v980_v63, %v980_v63  ;;  %v984_v6 = vadd.f32 %v983_v3, %v860_v50  ;;  %1422 = vmatprep.subr.bf16.mxu1 %v2852_v0  ;;  %v2857_v3 = vld [vmem:[#allocation7 + $0xe0] ss:$12 sps:$4 sm:$0xff]  }
 0xaf0   :  { %v990_v7 = vmul.f32 %v986_v1, %v978_v61  ;;  %v988_v8 = vmul.f32 %v982_v2, %v982_v2  ;;  %v2853_v1 = vld [vmem:[#allocation7 + $0xc8] ss:$12 sps:$4 sm:$0xff]  }
 0xaf1   :  { %v991_v9 = vmul.f32 %v987_v5, %v980_v63  ;;  %v989_v10 = vmul.f32 %v984_v6, %v984_v6  ;;  %v2854_v5 = vld [vmem:[#allocation7 + $0xd8] ss:$12 sps:$4 sm:$0xff]  }
 0xaf2   :  { %v994_v11 = vmul.f32 0.044715, %v990_v7  ;;  %v992_v12 = vmul.f32 %v988_v8, %v982_v2 }
 0xaf3   :  { %v995_v13 = vmul.f32 0.044715, %v991_v9  ;;  %v993_v15 = vmul.f32 %v989_v10, %v984_v6 }
 0xaf4   :  { %v998_v16 = vadd.f32 %v994_v11, %v978_v61  ;;  %v996_v18 = vmul.f32 0.044715, %v992_v12  ;;  %v2860_v12 = vld [vmem:[#allocation7 + $0xf4] ss:$12 sps:$4 sm:$0xff]  }
 0xaf5   :  { %v999_v20 = vadd.f32 %v995_v13, %v980_v63  ;;  %v997_v21 = vmul.f32 0.044715, %v993_v15  ;;  %v2858_v13 = vld [vmem:[#allocation7 + $0xf0] ss:$12 sps:$4 sm:$0xff]   ;;  %v2861_v15 = vld [vmem:[#allocation7 + $0xf8] ss:$12 sps:$4 sm:$0xff]  }
 0xaf6   :  { %v1002_v22 = vmul.f32 0.7978846, %v998_v16  ;;  %v1000_v23 = vadd.f32 %v996_v18, %v982_v2  ;;  %v2864_v16 = vld [vmem:[#allocation7 + $0x10c] ss:$12 sps:$4 sm:$0xff]   ;;  %v2862_v18 = vld [vmem:[#allocation7 + $0x108] ss:$12 sps:$4 sm:$0xff]  }
 0xaf7   :  { %v1003_v24 = vmul.f32 0.7978846, %v999_v20  ;;  %v1001_v25 = vadd.f32 %v997_v21, %v984_v6  ;;  %v2865_v20 = vld [vmem:[#allocation7 + $0x110] ss:$12 sps:$4 sm:$0xff]  }
 0xaf8   :  { %2954 = vtanh.f32 %v1002_v22  ;;  %v1004_v14 = vmul.f32 0.7978846, %v1000_v23  ;;  %v2868_v21 = vld [vmem:[#allocation7 + $0x124] ss:$12 sps:$4 sm:$0xff]   ;;  %v2866_v22 = vld [vmem:[#allocation7 + $0x120] ss:$12 sps:$4 sm:$0xff]  }
 0xaf9   :  { %2956 = vtanh.f32 %v1003_v24  ;;  %v1005_v26 = vmul.f32 0.7978846, %v1001_v25  ;;  %v2869_v23 = vld [vmem:[#allocation7 + $0x128] ss:$12 sps:$4 sm:$0xff]   ;;  %v2870_v25 = vld [vmem:[#allocation7 + $0x138] ss:$12 sps:$4 sm:$0xff]  }
 0xafa   :  { %2958 = vtanh.f32 %v1004_v14  ;;  %v2872_v24 = vld [vmem:[#allocation7 + $0x13c] ss:$12 sps:$4 sm:$0xff]   ;;  %v2873_v14 = vld [vmem:[#allocation7 + $0x140] ss:$12 sps:$4 sm:$0xff]  }
 0xafb   :  { %2960 = vtanh.f32 %v1005_v26  ;;  %v2876_v26 = vld [vmem:[#allocation7 + $0x154] ss:$12 sps:$4 sm:$0xff]  }
 0xb02   :  { %v2955_v27 = vpop.eup %2954 }
 0xb03   :  { %v2957_v28 = vpop.eup %2956  ;;  %v1010_v29 = vadd.f32 1.0, %v2955_v27  ;;  %v2874_v27 = vld [vmem:[#allocation7 + $0x150] ss:$12 sps:$4 sm:$0xff]  }
 0xb04   :  { %v2959_v31 = vpop.eup %2958  ;;  %v1011_v32 = vadd.f32 1.0, %v2957_v28  ;;  %v2877_v28 = vld [vmem:[#allocation7 + $0x158] ss:$12 sps:$4 sm:$0xff]  }
 0xb05   :  { %v2961_v33 = vpop.eup %2960  ;;  %v1014_v36 = vmul.f32 0.5, %v1010_v29  ;;  %v1012_v37 = vadd.f32 1.0, %v2959_v31  ;;  %v2880_v29 = vld [vmem:[#allocation7 + $0x16c] ss:$12 sps:$4 sm:$0xff]   ;;  %v2878_v31 = vld [vmem:[#allocation7 + $0x168] ss:$12 sps:$4 sm:$0xff]  }
 0xb06   :  { %v1013_v38 = vadd.f32 1.0, %v2961_v33  ;;  %v1015_v39 = vmul.f32 0.5, %v1011_v32  ;;  %v2881_v32 = vld [vmem:[#allocation7 + $0x170] ss:$12 sps:$4 sm:$0xff]  }
 0xb07   :  { %v1016_v40 = vmul.f32 0.5, %v1012_v37  ;;  %v1018_v42 = vmul.f32 %v1014_v36, %v978_v61 }
 0xb08   :  { %v1017_v41 = vmul.f32 0.5, %v1013_v38  ;;  %v1019_v44 = vmul.f32 %v1015_v39, %v980_v63  ;;  %v2850_v63 = vld [vmem:[#allocation7 + $0xc0] ss:$12 sps:$4 sm:$0xff]  }
 0xb09   :  { %v1020_v43 = vmul.f32 %v1016_v40, %v982_v2  ;;  %v2856_v2 = vld [vmem:[#allocation7 + $0xdc] ss:$12 sps:$4 sm:$0xff]   ;;  %1423 = vmatpush1.bf16.msra.mxu1 %v2850_v63 }
 0xb0a   :  { %v1021_v45 = vmul.f32 %v1017_v41, %v984_v6  ;;  %1424 = vmatprep.subr.bf16.mxu1 %v2856_v2 }
 0xb0b   :  { %v1022_v46 = vpack.c.bf16 %v1020_v43, %v1018_v42  ;;  %v2423_v42 = vld [vmem:[%s3701_s14] ss:$0 sm:$0xff] }
 0xb0c   :  { %v1023_v47 = vpack.c.bf16 %v1021_v45, %v1019_v44 }
 0xb0d   :  { %1425 = vmatpush1.bf16.msra.mxu1 %v2854_v5 }
 0xb0e   :  { %1191 = vmatprep.mubr.bf16.mxu0 %v1023_v47  ;;  %1426 = vmatprep.subr.bf16.mxu1 %v2860_v12  ;;  %v2424_v47 = vld [vmem:[%s3702_s15] ss:$0 sm:$0xff] }
 0xb0f   :  { %1192 = vmatmul.mubr.bf16.vlgmr.msra.gmra.mrb[8].mxu0 %v1022_v46 }
 0xb10   :  { %2699 = vmatprep.mubr.msk.bf16.mxu0 %vm3149_vm0, %v3147_v4  ;;  %2684 = vmatpush3.bf16.msra.mxu0 %v2853_v1 }
 0xb11   :  { %2685 = vmatprep.subr.bf16.mxu0 %v3147_v4  ;;  %1427 = vmatpush1.bf16.msra.mxu1 %v2858_v13 }
 0xb12   :  { %1428 = vmatprep.subr.bf16.mxu1 %v2864_v16 }
 0xb14   :  { %2686 = vmatpush3.bf16.msra.mxu0 %v2857_v3 }
 0xb15   :  { %2687 = vmatprep.subr.bf16.mxu0 %v3147_v4  ;;  %1429 = vmatpush1.bf16.msra.mxu1 %v2862_v18 }
 0xb16   :  { %1430 = vmatprep.subr.bf16.mxu1 %v2868_v21 }
 0xb18   :  { %2688 = vmatpush3.bf16.msra.mxu0 %v2861_v15 }
 0xb19   :  { %2689 = vmatprep.subr.bf16.mxu0 %v3147_v4  ;;  %1431 = vmatpush1.bf16.msra.mxu1 %v2866_v22 }
 0xb1a   :  { %1432 = vmatprep.subr.bf16.mxu1 %v2872_v24 }
 0xb1c   :  { %2690 = vmatpush3.bf16.msra.mxu0 %v2865_v20 }
 0xb1d   :  { %2691 = vmatprep.subr.bf16.mxu0 %v3147_v4  ;;  %1433 = vmatpush1.bf16.msra.mxu1 %v2870_v25 }
 0xb1e   :  { %1434 = vmatprep.subr.bf16.mxu1 %v2876_v26 }
 0xb20   :  { %2692 = vmatpush3.bf16.msra.mxu0 %v2869_v23 }
 0xb21   :  { %2693 = vmatprep.subr.bf16.mxu0 %v3147_v4  ;;  %1435 = vmatpush1.bf16.msra.mxu1 %v2874_v27 }
 0xb22   :  { %1436 = vmatprep.subr.bf16.mxu1 %v2880_v29 }
 0xb24   :  { %2694 = vmatpush3.bf16.msra.mxu0 %v2873_v14 }
 0xb25   :  { %2695 = vmatprep.subr.bf16.mxu0 %v3147_v4  ;;  %1437 = vmatpush1.bf16.msra.mxu1 %v2878_v31 }
 0xb26   :  { %2703 = vmatprep.subr.bf16.mxu1 %v3147_v4 }
 0xb28   :  { %2696 = vmatpush3.bf16.msra.mxu0 %v2877_v28 }
 0xb29   :  { %2697 = vmatprep.subr.bf16.mxu0 %v3147_v4 }
 0xb2c   :  { %2698 = vmatpush3.bf16.msra.mxu0 %v2881_v32 }
 0xb2d   :  { %2727 = vmatprep.subr.bf16.mxu0 %v3147_v4 }
 0xbe2   :  { %v2565_v49 = vpop.f32.mrb[8].mxu0 }
 0xbe3   :  { %v2566_v57 = vpop.f32.mrb[9].mxu0 }
 0xbe4   :  { %v2567_v52 = vadd.f32 %v2566_v57, %v2565_v49  ;;  %v2568_v48 = vpop.f32.mrb[10].mxu0 }
 0xbe5   :  { %v2569_v59 = vpop.f32.mrb[11].mxu0 }
 0xbe6   :  { %v1194_v60 = vadd.f32 %v2567_v52, %v2406_v53  ;;  %v2570_v50 = vadd.f32 %v2569_v59, %v2568_v48  ;;  %v2425_v48 = vld [vmem:[%s3692_s5 + $0x3] sm:$0x7] }
 0xbe7   :  { %v1282_v59 = vrot.slane %v2425_v48, %v3358_v55 }
 0xbe8   :  { %v1197_v51 = vadd.f32 %v2570_v50, %v2406_v53  ;;  %v1200_v61 = vadd.f32 %v1194_v60, %v3491_v34  ;;  %v1290_v60 = vrot.slane %v2425_v48, %v209_v56 }
 0xbea   :  { %1204 = vadd.xlane.f32.xlu0 %v1200_v61  ;;  %v1201_v62 = vadd.f32 %v1197_v51, %v3493_v35 }
 0xbec   :  { %1206 = vadd.xlane.f32.xlu1 %v1201_v62 }
 0xc77   :  { %v1205_v34 = vpop.xlane.xlu0 %1204 }
 0xc78   :  { %v1208_v6 = vmul.f32 0.0078125, %v1205_v34 }
 0xc79   :  { %v1207_v35 = vpop.xlane.xlu1 %1206 }
 0xc7a   :  { %v1210_v7 = vsub.f32 %v1200_v61, %v1208_v6  ;;  %v1209_v8 = vmul.f32 0.0078125, %v1207_v35  ;;  %v1286_v61 = vrot.slane %v2425_v48, %v3365_v58 }
 0xc7c   :  { %v1211_v9 = vsub.f32 %v1201_v62, %v1209_v8  ;;  %v1212_v10 = vmul.f32 %v1210_v7, %v1210_v7 }
 0xc7e   :  { %1214 = vadd.xlane.f32.xlu0 %v1212_v10  ;;  %v1213_v11 = vmul.f32 %v1211_v9, %v1211_v9 }
 0xc80   :  { %1216 = vadd.xlane.f32.xlu1 %v1213_v11 }
 0xd0b   :  { %v1215_v33 = vpop.xlane.xlu0 %1214 }
 0xd0c   :  { %v1218_v36 = vmul.f32 0.0078125, %v1215_v33 }
 0xd0d   :  { %v1217_v37 = vpop.xlane.xlu1 %1216 }
 0xd0e   :  { %v1220_v38 = vadd.f32 1e-12, %v1218_v36  ;;  %v1219_v39 = vmul.f32 0.0078125, %v1217_v37 }
 0xd10   :  { %2962 = vrsqrt.f32 %v1220_v38  ;;  %v1221_v40 = vadd.f32 1e-12, %v1219_v39 }
 0xd12   :  { %2964 = vrsqrt.f32 %v1221_v40 }
 0xd1a   :  { %v2963_v41 = vpop.eup %2962 }
 0xd1b   :  { %v1224_v43 = vmul.f32 %v2963_v41, %v1210_v7 }
 0xd1c   :  { %v2965_v44 = vpop.eup %2964 }
 0xd1d   :  { %v1225_v45 = vmul.f32 %v2965_v44, %v1211_v9  ;;  %v1232_v46 = vmul.f32 %v2423_v42, %v1224_v43 }
 0xd1f   :  { %v1233_v49 = vmul.f32 %v2423_v42, %v1225_v45  ;;  %v3526_v53 = vadd.f32 %v2424_v47, %v1232_v46 }
 0xd21   :  { %v3528_v57 = vadd.f32 %v2424_v47, %v1233_v49 }
 0xd23   :  { %v1242_v52 = vpack.c.bf16 %v3528_v57, %v3526_v53 }
 0xd25   :  { %1455 = vmatmul.mubr.bf16.vlgmr.msra.gmra.mrb[24].mxu1 %v1242_v52  ;;  %2700 = vmatmul.mubr.bf16.vlgmr.msra.gmra.mrb[12].mxu0 %v1242_v52 }
 0xd26   :  { %2705 = vmatprep.mubr.msk.bf16.mxu1 %vm3149_vm0, %v3147_v4  ;;  %2743 = vmatprep.mubr.msk.bf16.mxu0 %vm3149_vm0, %v3147_v4 }
 0xdf8   :  { %v1456_v50 = vpop.f32.mrb[24].mxu1  ;;  %v1499_v51 = vpop.f32.mrb[12].mxu0 }
 0xdf9   :  { %v1458_v62 = vpop.f32.mrb[25].mxu1  ;;  %v2701_v63 = vpop.f32.mrb[13].mxu0  ;;  %v1457_v2 = vadd.f32 %v1456_v50, %v1282_v59  ;;  %v1500_v3 = vadd.f32 %v1499_v51, %v1290_v60 }
 0xdfa   :  { %v1460_v0 = vpop.f32.mrb[26].mxu1  ;;  %v1502_v1 = vpop.f32.mrb[14].mxu0  ;;  %v1459_v7 = vadd.f32 %v1458_v62, %v1286_v61 }
 0xdfb   :  { %v1461_v5 = vadd.f32 %v1460_v0, %v1282_v59  ;;  %v1503_v34 = vadd.f32 %v1502_v1, %v1290_v60  ;;  %v1462_v6 = vpop.f32.mrb[27].mxu1  ;;  %v2702_v35 = vpop.f32.mrb[15].mxu0 }
 0xdfc   :  { %v1463_v8 = vadd.f32 %v1462_v6, %v1286_v61 }
 0xdfd   :  { %v1506_v9 = vpack.c.bf16 %v1461_v5, %v1457_v2  ;;  %v3543_v10 = vpack.c.bf16 %v1503_v34, %v1500_v3 }
 0xdfe   :  { %v1507_v54 = vpack.c.bf16 %v1463_v8, %v1459_v7 }
 0xe00   :  { %v1513_v56 = vsel %vm429_vm1, %v1507_v54, 0 }
 0xe01   :  { %2704 = vmatpush3.bf16.xpose.msra.mxu1 %v1513_v56 }
 0xe02   :  { %2709 = vmatprep.subr.bf16.mxu1 %v3147_v4 }
 0xe08   :  { %2706 = vmatmul.mubr.msk.bf16.vlgmr.msra.gmra.mrb[28].mxu1 %vm429_vm1, %v1506_v9 }
 0xe09   :  { %2710 = vmatpush3.bf16.msra.mxu1 %v3543_v10  ;;  %2711 = vmatprep.mubr.msk.bf16.mxu1 %vm3149_vm0, %v3147_v4 }
 0xe0a   :  { %2715 = vmatprep.subr.bf16.mxu1 %v3147_v4 }
 0xedb   :  { %v1549_v11 = vpop.f32.mrb[28].mxu1 }
 0xedc   :  { %v1550_v12 = vadd.f32 %v1549_v11, %v3383_v17  ;;  %v2707_v13 = vpop.f32.mrb[29].mxu1 }
 0xedd   :  { %v1552_v15 = vpop.f32.mrb[30].mxu1  ;;  %v2883_v13 = vld [vmem:[#allocation8 + $0x48] sm:$0xff]  }
 0xede   :  { %v1553_v16 = vadd.f32 %v1552_v15, %v3388_v19  ;;  %v2708_v18 = vpop.f32.mrb[31].mxu1  ;;  %v1556_v20 = vsel %vm477_vm2, %v1550_v12, -inf  ;;  %v2885_v15 = vld [vmem:[#allocation8 + $0x58] sm:$0xff]  }
 0xedf   :  { %1557 = vmax.xlane.f32.xlu0 %v1556_v20  ;;  %v2887_v18 = vld [vmem:[#allocation8 + $0x68] sm:$0xff]   ;;  %v2889_v20 = vld [vmem:[#allocation8 + $0x78] sm:$0xff]  }
 0xee0   :  { %v1559_v21 = vsel %vm477_vm2, %v1553_v16, -inf }
 0xee1   :  { %1560 = vmax.xlane.f32.xlu1 %v1559_v21 }
 0xf6c   :  { %v1558_v22 = vpop.xlane.xlu0 %1557 }
 0xf6d   :  { %v1562_v23 = vsub.f32 %v1550_v12, %v1558_v22  ;;  %v2882_v12 = vld [vmem:[#allocation8 + $0x40] sm:$0xff]  }
 0xf6e   :  { %v1561_v24 = vpop.xlane.xlu1 %1560  ;;  %2728 = vmatpush3.bf16.msra.mxu0 %v2882_v12 }
 0xf6f   :  { %v1564_v25 = vmul.f32 1.442695, %v1562_v23  ;;  %v1563_v14 = vsub.f32 %v1553_v16, %v1561_v24  ;;  %2729 = vmatprep.subr.bf16.mxu0 %v3147_v4  ;;  %v2886_v16 = vld [vmem:[#allocation8 + $0x60] sm:$0xff]  }
 0xf71   :  { %2966 = vpow2.f32 %v1564_v25  ;;  %v1566_v26 = vmul.f32 1.442695, %v1563_v14 }
 0xf72   :  { %2730 = vmatpush3.bf16.msra.mxu0 %v2883_v13 }
 0xf73   :  { %2968 = vpow2.f32 %v1566_v26  ;;  %2731 = vmatprep.subr.bf16.mxu0 %v3147_v4 }
 0xf7b   :  { %v2967_v27 = vpop.eup %2966 }
 0xf7c   :  { %v1568_v28 = vsel %vm477_vm2, %v2967_v27, 0.0 }
 0xf7d   :  { %v2969_v29 = vpop.eup %2968  ;;  %1569 = vadd.xlane.f32.xlu0 %v1568_v28 }
 0xf7e   :  { %v1571_v31 = vsel %vm477_vm2, %v2969_v29, 0.0 }
 0xf7f   :  { %1572 = vadd.xlane.f32.xlu1 %v1571_v31 }
 0xf90   :  { %1624 = vrot.lane.b32.xlu1 %v1506_v9, %s3140_s3 }
 0xf93   :  { %1627 = vrot.lane.b32.xlu0 %v1507_v54, %s3140_s3 }
0x100a   :  { %v1570_v32 = vpop.xlane.xlu0 %1569 }
0x100b   :  { %2970 = vrcp.f32 %v1570_v32 }
0x100c   :  { %v1573_v33 = vpop.xlane.xlu1 %1572 }
0x100d   :  { %2972 = vrcp.f32 %v1573_v33 }
0x100e   :  { %v1628_v40 = vpop.permute.xlu0 %1627 }
0x100f   :  { %v1633_v42 = vsel %vm429_vm1, %v1628_v40, 0 }
0x1010   :  { %v1625_v43 = vpop.permute.xlu1 %1624 }
0x1015   :  { %v2971_v36 = vpop.eup %2970 }
0x1016   :  { %v1576_v38 = vmul.f32 %v2971_v36, %v2967_v27 }
0x1017   :  { %v2973_v37 = vpop.eup %2972 }
0x1018   :  { %v1577_v39 = vmul.f32 %v2973_v37, %v2969_v29 }
0x101a   :  { %v1578_v41 = vpack.c.bf16 %v1577_v39, %v1576_v38 }
0x101c   :  { %2712 = vmatmul.mubr.msk.bf16.vlgmr.msra.gmra.mrb[32].mxu1 %vm477_vm2, %v1578_v41 }
0x101d   :  { %2716 = vmatpush3.bf16.xpose.msra.mxu1 %v1633_v42  ;;  %2717 = vmatprep.mubr.msk.bf16.mxu1 %vm3149_vm0, %v3147_v4  ;;  %v2890_v42 = vld [vmem:[%s3697_s10 + $0x80] ss:$8 sps:$4 sm:$0xff]  }
0x101e   :  { %2721 = vmatprep.subr.bf16.mxu1 %v3147_v4 }
0x1024   :  { %2718 = vmatmul.mubr.msk.bf16.vlgmr.msra.gmra.mrb[36].mxu1 %vm429_vm1, %v1625_v43  ;;  %v2892_v43 = vld [vmem:[%s3697_s10 + $0x84] ss:$8 sps:$4 sm:$0xff]  }
0x1025   :  { %2723 = vmatprep.mubr.msk.bf16.mxu1 %vm3149_vm0, %v3147_v4 }
0x10ef   :  { %v3568_v44 = vpop.f32.mrb[32].mxu1 }
0x10f0   :  { %v2713_v45 = vpop.f32.mrb[33].mxu1 }
0x10f1   :  { %v3570_v46 = vpop.f32.mrb[34].mxu1 }
0x10f2   :  { %v2714_v47 = vpop.f32.mrb[35].mxu1 }
0x10f7   :  { %v1669_v49 = vpop.f32.mrb[36].mxu1 }
0x10f8   :  { %v1670_v52 = vadd.f32 %v1669_v49, %v3383_v17  ;;  %v2719_v48 = vpop.f32.mrb[37].mxu1 }
0x10f9   :  { %v1672_v59 = vpop.f32.mrb[38].mxu1 }
0x10fa   :  { %v1673_v60 = vadd.f32 %v1672_v59, %v3388_v19  ;;  %v2720_v50 = vpop.f32.mrb[39].mxu1  ;;  %v1676_v51 = vsel %vm477_vm2, %v1670_v52, -inf }
0x10fb   :  { %1677 = vmax.xlane.f32.xlu1 %v1676_v51  ;;  %v2896_v50 = vld [vmem:[%s3697_s10 + $0xa0] ss:$8 sps:$4 sm:$0xff]   ;;  %v2901_v51 = vld [vmem:[%s3697_s10 + $0xb4] ss:$8 sps:$4 sm:$0xff]  }
0x10fc   :  { %v1679_v61 = vsel %vm477_vm2, %v1673_v60, -inf }
0x10fd   :  { %1680 = vmax.xlane.f32.xlu0 %v1679_v61  ;;  %v2899_v61 = vld [vmem:[%s3697_s10 + $0xb0] ss:$8 sps:$4 sm:$0xff]  }
0x1188   :  { %v1678_v62 = vpop.xlane.xlu1 %1677 }
0x1189   :  { %v1682_v63 = vsub.f32 %v1670_v52, %v1678_v62  ;;  %v2904_v62 = vld [vmem:[%s3697_s10 + $0xc4] ss:$8 sps:$4 sm:$0xff]  }
0x118a   :  { %v1681_v0 = vpop.xlane.xlu0 %1680 }
0x118b   :  { %v1684_v1 = vmul.f32 1.442695, %v1682_v63  ;;  %v1683_v2 = vsub.f32 %v1673_v60, %v1681_v0  ;;  %v2898_v60 = vld [vmem:[%s3697_s10 + $0xa4] ss:$8 sps:$4 sm:$0xff]   ;;  %v2902_v63 = vld [vmem:[%s3697_s10 + $0xc0] ss:$8 sps:$4 sm:$0xff]  }
0x118c   :  { %v2907_v0 = vld [vmem:[%s3697_s10 + $0xd4] ss:$8 sps:$4 sm:$0xff]  }
0x118d   :  { %2974 = vpow2.f32 %v1684_v1  ;;  %v1686_v3 = vmul.f32 1.442695, %v1683_v2  ;;  %v2905_v1 = vld [vmem:[%s3697_s10 + $0xd0] ss:$8 sps:$4 sm:$0xff]   ;;  %v2910_v2 = vld [vmem:[%s3697_s10 + $0xe4] ss:$8 sps:$4 sm:$0xff]  }
0x118f   :  { %2976 = vpow2.f32 %v1686_v3  ;;  %v2908_v3 = vld [vmem:[%s3697_s10 + $0xe0] ss:$8 sps:$4 sm:$0xff]  }
0x1197   :  { %v2975_v17 = vpop.eup %2974 }
0x1198   :  { %v1688_v5 = vsel %vm477_vm2, %v2975_v17, 0.0 }
0x1199   :  { %v2977_v34 = vpop.eup %2976  ;;  %1689 = vadd.xlane.f32.xlu0 %v1688_v5  ;;  %v2911_v5 = vld [vmem:[%s3697_s10 + $0xf0] ss:$8 sps:$4 sm:$0xff]  }
0x119a   :  { %v1691_v19 = vsel %vm477_vm2, %v2977_v34, 0.0 }
0x119b   :  { %1692 = vadd.xlane.f32.xlu1 %v1691_v19 }
0x11af   :  { %1700 = vrot.lane.b32.xlu0 %v3543_v10, %s3140_s3  ;;  %v2884_v10 = vld [vmem:[#allocation8 + $0x50] sm:$0xff]  }
0x11b0   :  { %2732 = vmatpush3.bf16.msra.mxu0 %v2884_v10  ;;  %v2467_v10 = vld [vmem:[%s3696_s9 + $0x1] ss:$0 sm:$0xff] }
0x11b1   :  { %2733 = vmatprep.subr.bf16.mxu0 %v3147_v4 }
0x11b4   :  { %2734 = vmatpush3.bf16.msra.mxu0 %v2885_v15 }
0x11b5   :  { %2735 = vmatprep.subr.bf16.mxu0 %v3147_v4 }
0x11b8   :  { %2736 = vmatpush3.bf16.msra.mxu0 %v2886_v16 }
0x11b9   :  { %2737 = vmatprep.subr.bf16.mxu0 %v3147_v4 }
0x11bc   :  { %2738 = vmatpush3.bf16.msra.mxu0 %v2887_v18 }
0x11bd   :  { %2739 = vmatprep.subr.bf16.mxu0 %v3147_v4 }
0x1226   :  { %v1690_v6 = vpop.xlane.xlu0 %1689 }
0x1227   :  { %2978 = vrcp.f32 %v1690_v6 }
0x1228   :  { %v1693_v35 = vpop.xlane.xlu1 %1692 }
0x1229   :  { %2980 = vrcp.f32 %v1693_v35 }
0x122a   :  { %v1701_v7 = vpop.permute.xlu0 %1700 }
0x122b   :  { %2722 = vmatpush3.bf16.msra.mxu1 %v1701_v7 }
0x122c   :  { %2027 = vmatprep.subr.bf16.mxu1 %v2892_v43 }
0x1231   :  { %v2979_v8 = vpop.eup %2978 }
0x1232   :  { %v1696_v54 = vmul.f32 %v2979_v8, %v2975_v17  ;;  %v2913_v17 = vld [vmem:[%s3697_s10 + $0xf4] ss:$8 sps:$4 sm:$0xff]  }
0x1233   :  { %v2981_v9 = vpop.eup %2980 }
0x1234   :  { %v1697_v56 = vmul.f32 %v2981_v9, %v2977_v34 }
0x1236   :  { %v1698_v11 = vpack.c.bf16 %v1697_v56, %v1696_v54  ;;  %v2466_v54 = vld [vmem:[%s3695_s8 + $0x1] ss:$0 sm:$0xff] }
0x1238   :  { %2724 = vmatmul.mubr.msk.bf16.vlgmr.msra.gmra.mrb[40].mxu1 %vm477_vm2, %v1698_v11 }
0x1239   :  { %2059 = vmatprep.mubr.bf16.mxu1 %v3148_v30  ;;  %v2888_v30 = vld [vmem:[#allocation8 + $0x70] sm:$0xff]   ;;  %2028 = vmatpush1.bf16.msra.mxu1 %v2890_v42 }
0x123a   :  { %2740 = vmatpush3.bf16.msra.mxu0 %v2888_v30 }
0x123b   :  { %2741 = vmatprep.subr.bf16.mxu0 %v3147_v4  ;;  %v2455_v4 = vld [vmem:[%s3694_s7 + $0x1] ss:$0 sm:$0xff] }
0x123e   :  { %2742 = vmatpush3.bf16.msra.mxu0 %v2889_v20  ;;  %v2914_v20 = vld [vmem:[#allocation10 + $0xc0] sm:$0xff]  }
0x123f   :  { %2597 = vmatprep.subr.bf16.mxu0 %v2914_v20 }
0x130b   :  { %v1740_v21 = vpop.f32.mrb[40].mxu1 }
0x130c   :  { %v2725_v22 = vpop.f32.mrb[41].mxu1 }
0x130d   :  { %v1743_v23 = vpop.f32.mrb[42].mxu1  ;;  %v2916_v22 = vld [vmem:[#allocation10 + $0xc8] sm:$0xff]  }
0x130e   :  { %v2765_v24 = vpack.i.bf16 %v1743_v23, %v1740_v21  ;;  %v2726_v25 = vpop.f32.mrb[43].mxu1  ;;  %v2915_v21 = vld [vmem:[#allocation10 + $0x80] sm:$0xff]   ;;  %v2917_v23 = vld [vmem:[#allocation10 + $0x88] sm:$0xff]  }
0x130f   :  { %v2919_v25 = vld [vmem:[#allocation10 + $0x90] sm:$0xff]  }
0x1310   :  { %2766 = vrot.lane.b32.xlu1 %v2765_v24, %s3140_s3  ;;  %v2918_v24 = vld [vmem:[#allocation10 + $0xd0] sm:$0xff]  }
0x1382   :  { %v2767_v14 = vpop.permute.xlu1 %2766 }
0x1383   :  { %v2769_v26 = vunpack.i.h.bf16 %v2767_v14  ;;  %v2768_v27 = vunpack.i.l.bf16 %v2767_v14  ;;  %v2920_v14 = vld [vmem:[#allocation10 + $0xd8] sm:$0xff]  }
0x1385   :  { %v1756_v28 = vsel %vm429_vm1, %v3570_v46, %v2769_v26  ;;  %v1755_v29 = vsel %vm429_vm1, %v3568_v44, %v2768_v27  ;;  %v2895_v44 = vld [vmem:[%s3697_s10 + $0x94] ss:$8 sps:$4 sm:$0xff]   ;;  %v2922_v27 = vld [vmem:[#allocation10 + $0xe0] sm:$0xff]  }
0x1386   :  { %v1757_v31 = vpack.c.bf16 %v1756_v28, %v1755_v29  ;;  %2029 = vmatprep.subr.bf16.mxu1 %v2895_v44  ;;  %v2921_v26 = vld [vmem:[#allocation10 + $0x98] sm:$0xff]   ;;  %v2923_v28 = vld [vmem:[#allocation10 + $0xa0] sm:$0xff]   ;;  %v2924_v29 = vld [vmem:[#allocation10 + $0xe8] sm:$0xff]  }
0x1388   :  { %2744 = vmatmul.mubr.bf16.vlgmr.msra.gmra.mrb[16].mxu0 %v1757_v31  ;;  %v2925_v31 = vld [vmem:[#allocation10 + $0xa8] sm:$0xff]  }
0x1389   :  { %2598 = vmatpush3.bf16.msra.mxu0 %v2915_v21 }
0x138a   :  { %2599 = vmatprep.subr.bf16.mxu0 %v2916_v22 }
0x138d   :  { %2600 = vmatpush3.bf16.msra.mxu0 %v2917_v23 }
0x138e   :  { %2601 = vmatprep.subr.bf16.mxu0 %v2918_v24  ;;  %v2502_v24 = vld [vmem:[%s3700_s13 + $0x1] ss:$0 sm:$0xff] }
0x1391   :  { %2602 = vmatpush3.bf16.msra.mxu0 %v2919_v25 }
0x1392   :  { %2603 = vmatprep.subr.bf16.mxu0 %v2920_v14 }
0x1395   :  { %2604 = vmatpush3.bf16.msra.mxu0 %v2921_v26 }
0x1396   :  { %2605 = vmatprep.subr.bf16.mxu0 %v2922_v27 }
0x1399   :  { %2606 = vmatpush3.bf16.msra.mxu0 %v2923_v28 }
0x139a   :  { %2607 = vmatprep.subr.bf16.mxu0 %v2924_v29 }
0x139d   :  { %2608 = vmatpush3.bf16.msra.mxu0 %v2925_v31 }
0x145b   :  { %v1865_v32 = vpop.f32.mrb[16].mxu0 }
0x145c   :  { %v1866_v33 = vadd.f32 %v2455_v4, %v1865_v32  ;;  %v2745_v36 = vpop.f32.mrb[17].mxu0  ;;  %v2927_v32 = vld [vmem:[#allocation10 + $0xb0] sm:$0xff]  }
0x145d   :  { %v1868_v37 = vpop.f32.mrb[18].mxu0  ;;  %v2929_v36 = vld [vmem:[#allocation10 + $0xb8] sm:$0xff]  }
0x145e   :  { %v1869_v38 = vadd.f32 %v2455_v4, %v1868_v37  ;;  %v2746_v39 = vpop.f32.mrb[19].mxu0  ;;  %v1872_v40 = vadd.f32 %v1866_v33, %v3526_v53  ;;  %v2893_v53 = vld [vmem:[%s3697_s10 + $0x90] ss:$8 sps:$4 sm:$0xff]   ;;  %v2928_v33 = vld [vmem:[#allocation10 + $0xf8] sm:$0xff]  }
0x145f   :  { %2030 = vmatpush1.bf16.msra.mxu1 %v2893_v53  ;;  %v2926_v4 = vld [vmem:[#allocation10 + $0xf0] sm:$0xff]   ;;  %v2484_v37 = vld [vmem:[%s3698_s11 + $0x2] sm:$0x3] }
0x1460   :  { %1878 = vadd.xlane.f32.xlu1 %v1872_v40  ;;  %v1873_v41 = vadd.f32 %v1869_v38, %v3528_v57  ;;  %2031 = vmatprep.subr.bf16.mxu1 %v2898_v60  ;;  %v1940_v38 = vrot.slane %v2484_v37, %v3358_v55  ;;  %v1944_v39 = vrot.slane %v2484_v37, %v3365_v58 }
0x1461   :  { %2609 = vmatprep.subr.bf16.mxu0 %v2926_v4 }
0x1462   :  { %1880 = vadd.xlane.f32.xlu0 %v1873_v41  ;;  %2610 = vmatpush3.bf16.msra.mxu0 %v2927_v32 }
0x1463   :  { %2032 = vmatpush1.bf16.msra.mxu1 %v2896_v50  ;;  %2611 = vmatprep.subr.bf16.mxu0 %v2928_v33 }
0x1464   :  { %2033 = vmatprep.subr.bf16.mxu1 %v2901_v51 }
0x1466   :  { %2612 = vmatpush3.bf16.msra.mxu0 %v2929_v36 }
0x1467   :  { %2034 = vmatpush1.bf16.msra.mxu1 %v2899_v61 }
0x1468   :  { %2035 = vmatprep.subr.bf16.mxu1 %v2904_v62 }
0x146b   :  { %2036 = vmatpush1.bf16.msra.mxu1 %v2902_v63 }
0x146c   :  { %2037 = vmatprep.subr.bf16.mxu1 %v2907_v0 }
0x146f   :  { %2038 = vmatpush1.bf16.msra.mxu1 %v2905_v1 }
0x1470   :  { %2039 = vmatprep.subr.bf16.mxu1 %v2910_v2 }
0x1473   :  { %2040 = vmatpush1.bf16.msra.mxu1 %v2908_v3 }
0x1474   :  { %2041 = vmatprep.subr.bf16.mxu1 %v2913_v17 }
0x1477   :  { %2042 = vmatpush1.bf16.msra.mxu1 %v2911_v5 }
0x14ed   :  { %v1879_v57 = vpop.xlane.xlu1 %1878 }
0x14ee   :  { %v1882_v45 = vmul.f32 0.0078125, %v1879_v57 }
0x14ef   :  { %v1881_v46 = vpop.xlane.xlu0 %1880 }
0x14f0   :  { %v1884_v47 = vsub.f32 %v1872_v40, %v1882_v45  ;;  %v1883_v49 = vmul.f32 0.0078125, %v1881_v46 }
0x14f2   :  { %v1885_v52 = vsub.f32 %v1873_v41, %v1883_v49  ;;  %v1886_v48 = vmul.f32 %v1884_v47, %v1884_v47 }
0x14f4   :  { %1888 = vadd.xlane.f32.xlu0 %v1886_v48  ;;  %v1887_v59 = vmul.f32 %v1885_v52, %v1885_v52 }
0x14f6   :  { %1890 = vadd.xlane.f32.xlu1 %v1887_v59 }
0x1581   :  { %v1889_v34 = vpop.xlane.xlu0 %1888 }
0x1582   :  { %v1892_v19 = vmul.f32 0.0078125, %v1889_v34 }
0x1583   :  { %v1891_v6 = vpop.xlane.xlu1 %1890 }
0x1584   :  { %v1894_v35 = vadd.f32 1e-12, %v1892_v19  ;;  %v1893_v7 = vmul.f32 0.0078125, %v1891_v6 }
0x1586   :  { %2982 = vrsqrt.f32 %v1894_v35  ;;  %v1895_v8 = vadd.f32 1e-12, %v1893_v7 }
0x1588   :  { %2984 = vrsqrt.f32 %v1895_v8 }
0x1590   :  { %v2983_v9 = vpop.eup %2982 }
0x1591   :  { %v1898_v56 = vmul.f32 %v2983_v9, %v1884_v47 }
0x1592   :  { %v2985_v11 = vpop.eup %2984 }
0x1593   :  { %v1899_v12 = vmul.f32 %v2985_v11, %v1885_v52  ;;  %v1906_v13 = vmul.f32 %v2466_v54, %v1898_v56 }
0x1595   :  { %v1907_v15 = vmul.f32 %v2466_v54, %v1899_v12  ;;  %v3653_v16 = vadd.f32 %v2467_v10, %v1906_v13 }
0x1597   :  { %v3655_v18 = vadd.f32 %v2467_v10, %v1907_v15 }
0x1599   :  { %v1916_v30 = vpack.c.bf16 %v3655_v18, %v3653_v16 }
0x159b   :  { %2060 = vmatmul.mubr.bf16.vlgmr.msra.gmra.mrb[44].mxu1 %v1916_v30 }
0x166e   :  { %v2061_v40 = vpop.f32.mrb[44].mxu1 }
0x166f   :  { %v2062_v41 = vadd.f32 %v2061_v40, %v1940_v38  ;;  %v2063_v42 = vpop.f32.mrb[45].mxu1 }
0x1670   :  { %v2064_v43 = vadd.f32 %v2063_v42, %v1944_v39  ;;  %v2065_v44 = vpop.f32.mrb[46].mxu1 }
0x1671   :  { %v2070_v53 = vmul.f32 %v2062_v41, %v2062_v41  ;;  %v2066_v57 = vadd.f32 %v2065_v44, %v1940_v38  ;;  %v2067_v45 = vpop.f32.mrb[47].mxu1 }
0x1672   :  { %v2071_v46 = vmul.f32 %v2064_v43, %v2064_v43  ;;  %v2068_v47 = vadd.f32 %v2067_v45, %v1944_v39 }
0x1673   :  { %v2074_v49 = vmul.f32 %v2070_v53, %v2062_v41  ;;  %v2072_v52 = vmul.f32 %v2066_v57, %v2066_v57 }
0x1674   :  { %v2075_v48 = vmul.f32 %v2071_v46, %v2064_v43  ;;  %v2073_v59 = vmul.f32 %v2068_v47, %v2068_v47  ;;  %v2521_v46 = vld [vmem:[%s3701_s14 + $0x1] ss:$0 sm:$0xff] }
0x1675   :  { %v2078_v60 = vmul.f32 0.044715, %v2074_v49  ;;  %v2076_v50 = vmul.f32 %v2072_v52, %v2066_v57  ;;  %v2522_v52 = vld [vmem:[%s3702_s15 + $0x1] ss:$0 sm:$0xff] }
0x1676   :  { %v2079_v51 = vmul.f32 0.044715, %v2075_v48  ;;  %v2077_v55 = vmul.f32 %v2073_v59, %v2068_v47 }
0x1677   :  { %v2082_v61 = vadd.f32 %v2078_v60, %v2062_v41  ;;  %v2080_v58 = vmul.f32 0.044715, %v2076_v50 }
0x1678   :  { %v2083_v62 = vadd.f32 %v2079_v51, %v2064_v43  ;;  %v2081_v63 = vmul.f32 0.044715, %v2077_v55 }
0x1679   :  { %v2086_v0 = vmul.f32 0.7978846, %v2082_v61  ;;  %v2084_v1 = vadd.f32 %v2080_v58, %v2066_v57 }
0x167a   :  { %v2087_v2 = vmul.f32 0.7978846, %v2083_v62  ;;  %v2085_v3 = vadd.f32 %v2081_v63, %v2068_v47 }
0x167b   :  { %2986 = vtanh.f32 %v2086_v0  ;;  %v2088_v17 = vmul.f32 0.7978846, %v2084_v1 }
0x167c   :  { %2988 = vtanh.f32 %v2087_v2  ;;  %v2089_v5 = vmul.f32 0.7978846, %v2085_v3 }
0x167d   :  { %2990 = vtanh.f32 %v2088_v17 }
0x167e   :  { %2992 = vtanh.f32 %v2089_v5 }
0x1685   :  { %v2987_v34 = vpop.eup %2986 }
0x1686   :  { %v2989_v19 = vpop.eup %2988  ;;  %v2094_v6 = vadd.f32 1.0, %v2987_v34 }
0x1687   :  { %v2991_v35 = vpop.eup %2990  ;;  %v2095_v7 = vadd.f32 1.0, %v2989_v19 }
0x1688   :  { %v2993_v8 = vpop.eup %2992  ;;  %v2098_v9 = vmul.f32 0.5, %v2094_v6  ;;  %v2096_v54 = vadd.f32 1.0, %v2991_v35 }
0x1689   :  { %v2097_v56 = vadd.f32 1.0, %v2993_v8  ;;  %v2099_v11 = vmul.f32 0.5, %v2095_v7 }
0x168a   :  { %v2100_v12 = vmul.f32 0.5, %v2096_v54  ;;  %v2102_v10 = vmul.f32 %v2098_v9, %v2062_v41 }
0x168b   :  { %v2101_v13 = vmul.f32 0.5, %v2097_v56  ;;  %v2103_v30 = vmul.f32 %v2099_v11, %v2064_v43 }
0x168c   :  { %v2104_v15 = vmul.f32 %v2100_v12, %v2066_v57 }
0x168d   :  { %v2105_v20 = vmul.f32 %v2101_v13, %v2068_v47 }
0x168e   :  { %v2106_v21 = vpack.c.bf16 %v2104_v15, %v2102_v10 }
0x168f   :  { %v2107_v22 = vpack.c.bf16 %v2105_v20, %v2103_v30 }
0x1691   :  { %2277 = vmatprep.mubr.bf16.mxu0 %v2107_v22 }
0x1692   :  { %2278 = vmatmul.mubr.bf16.vlgmr.msra.gmra.mrb[20].mxu0 %v2106_v21 }
0x1765   :  { %v2613_v23 = vpop.f32.mrb[20].mxu0 }
0x1766   :  { %v2614_v25 = vpop.f32.mrb[21].mxu0 }
0x1767   :  { %v2615_v14 = vadd.f32 %v2614_v25, %v2613_v23  ;;  %v2616_v26 = vpop.f32.mrb[22].mxu0 }
0x1768   :  { %v2617_v27 = vpop.f32.mrb[23].mxu0 }
0x1769   :  { %v2280_v28 = vadd.f32 %v2615_v14, %v2502_v24  ;;  %v2618_v29 = vadd.f32 %v2617_v27, %v2616_v26 }
0x176b   :  { %v2283_v31 = vadd.f32 %v2618_v29, %v2502_v24  ;;  %v2286_v4 = vadd.f32 %v2280_v28, %v3653_v16 }
0x176d   :  { %2292 = vadd.xlane.f32.xlu0 %v2286_v4  ;;  %v2287_v32 = vadd.f32 %v2283_v31, %v3655_v18 }
0x176f   :  { %2294 = vadd.xlane.f32.xlu1 %v2287_v32 }
0x17fa   :  { %v2293_v33 = vpop.xlane.xlu0 %2292 }
0x17fb   :  { %v2296_v36 = vmul.f32 0.0078125, %v2293_v33 }
0x17fc   :  { %v2295_v37 = vpop.xlane.xlu1 %2294 }
0x17fd   :  { %v2298_v38 = vsub.f32 %v2286_v4, %v2296_v36  ;;  %v2297_v39 = vmul.f32 0.0078125, %v2295_v37 }
0x17ff   :  { %v2299_v40 = vsub.f32 %v2287_v32, %v2297_v39  ;;  %v2300_v41 = vmul.f32 %v2298_v38, %v2298_v38 }
0x1801   :  { %2302 = vadd.xlane.f32.xlu0 %v2300_v41  ;;  %v2301_v42 = vmul.f32 %v2299_v40, %v2299_v40 }
0x1803   :  { %2304 = vadd.xlane.f32.xlu1 %v2301_v42 }
0x188e   :  { %v2303_v43 = vpop.xlane.xlu0 %2302 }
0x188f   :  { %v2306_v44 = vmul.f32 0.0078125, %v2303_v43 }
0x1890   :  { %v2305_v53 = vpop.xlane.xlu1 %2304 }
0x1891   :  { %v2308_v57 = vadd.f32 1e-12, %v2306_v44  ;;  %v2307_v45 = vmul.f32 0.0078125, %v2305_v53 }
0x1893   :  { %2994 = vrsqrt.f32 %v2308_v57  ;;  %v2309_v16 = vadd.f32 1e-12, %v2307_v45 }
0x1895   :  { %2996 = vrsqrt.f32 %v2309_v16 }
0x189d   :  { %v2995_v18 = vpop.eup %2994 }
0x189e   :  { %v2312_v47 = vmul.f32 %v2995_v18, %v2298_v38 }
0x189f   :  { %v2997_v49 = vpop.eup %2996 }
0x18a0   :  { %v2313_v48 = vmul.f32 %v2997_v49, %v2299_v40  ;;  %v2320_v59 = vmul.f32 %v2521_v46, %v2312_v47 }
0x18a2   :  { %v2321_v60 = vmul.f32 %v2521_v46, %v2313_v48  ;;  %v2328_v50 = vadd.f32 %v2522_v52, %v2320_v59 }
0x18a4   :  { %v2329_v51 = vadd.f32 %v2522_v52, %v2321_v60  ;;  %2330 = vst [vmem:[#allocation11] sm:$0x1] %v2328_v50 }
0x18a6   :  { %2331 = vst [vmem:[#allocation11 + $0x1] sm:$0x1] %v2329_v51 }
0x18a7   :  { %3119 = shalt.err (!%p3116_p2)
}
0x18a8   :  { %s3120_s15 = scalar_lea.hbm %s3703_s16, 32 }
0x18a9   :  { %p3121_p3 = scmp.ne.s32.totalorder %s3703_s16, %s3120_s15  ;;  %p3124_p4 = scmp.lt.u32.totalorder %s3120_s15, %s3703_s16 }
0x18ab   :  { %p3126_p5 = pnand %p3124_p4, %p3121_p3 }
0x18ad   :  { %3129 = shalt.err (!%p3126_p5)
}
0x18ae   :  { %2341 = dma.vmem_to_hbm [thread:$0]  %s2339_s26, 32, %s3703_s16, [#allocation4]  }
0x18af   :  { %3136 = dma.done.wait [#allocation4], 32  }
0x18b0   :  { %3137 = vsyncadd [#allocation4], 4294967264 }
0x18b1   :  { %2345 = vsyncpa [#allocation3], 1 }
0x18b2   :  { %2346 = vsyncpa [#allocation6], 1 }
0x18b3   :  { %2347 = vsyncpa [#allocation9], 1 }
0x18b4   :  { %2348 = vsyncpa [#allocation4], 1 }

</bundles_post_ra>
